<compile_context>
chip_gen: v7x
topology: tpu7x:2x2x1
jax: 0.10.0
libtpu: 0.0.40
codegen_flags: <defaults>
</compile_context>

<pallas_src>
import functools

import jax
import jax.numpy as jnp
from jax.experimental import pallas as pl
from jax.experimental.pallas import tpu as pltpu


def _dir_scan_kernel(x_ref, w_ref, b_ref, sh_ref, m_ref, o_ref):
    """One batch-block of the directional scan.

    x_ref, o_ref : (S, Cp, NLp) f32  scan-major slab (lanes = batch_block*L, padded)
    w_ref        : (K, Cp, Cp)  f32  per-tap channel-mix matrices W_k[o, c]
    b_ref        : (Cp, NLp)    f32  conv bias, pre-broadcast, 0 at pad lanes/chans
    sh_ref       : (K, NLp,NLp) f32  per-tap segment-local lane-shift matrices
    m_ref        : (NLp, NLp)   f32  segment-mean matrix (1/L inside each segment)
    """
    S, Cp, NLp = x_ref.shape
    K = w_ref.shape[0]
    eps = 1e-5

    # Hoisted loop invariants (small; loaded once, live across the serial scan).
    # The big (NLp,NLp) matrices are read straight from their VMEM input blocks
    # inside apply_f (a vld feeding the MXU) to avoid duplicating them.
    w_taps = [w_ref[k] for k in range(K)]
    bias_b = b_ref[...]

    def apply_f(s):
        # --- Conv2d (effective 1-D conv along L): y = bias + sum_k W_k @ s @ Sh_k
        # Channel mix (Cp,Cp)@(Cp,NLp) and tap shift (Cp,NLp)@(NLp,NLp) both run
        # on the MXU; Sh_k is banded & block-diagonal per batch segment.
        y = bias_b
        for k in range(K):
            zk = jnp.dot(w_taps[k], s, preferred_element_type=jnp.float32)
            y = y + jnp.dot(zk, sh_ref[k], preferred_element_type=jnp.float32)
        # --- InstanceNorm2d (affine=False): per (n, c) over L, biased var, eps
        m_mat = m_ref[...]
        mean_b = jnp.dot(y, m_mat, preferred_element_type=jnp.float32)
        cen = y - mean_b
        var_b = jnp.dot(cen * cen, m_mat, preferred_element_type=jnp.float32)
        yn = cen * jax.lax.rsqrt(var_b + eps)
        # --- ELU(alpha=1)
        # TODO(synk): jnp.expm1 would be marginally more accurate near 0-, but
        # exp(min(y,0))-1 is kept because expm1 lowering support in Mosaic is
        # not guaranteed; the absolute difference here is ~1e-7.
        return jnp.where(yn > 0.0, yn, jnp.exp(jnp.minimum(yn, 0.0)) - 1.0)

    # Forward sweep: state carried in the loop carry, one store per step.
    state0 = x_ref[0]
    o_ref[0] = state0

    def fwd(i, state):
        new = apply_f(state) + x_ref[i]
        o_ref[i] = new
        return new

    last = jax.lax.fori_loop(1, S, fwd, state0)

    # Backward sweep: stack[p] = f(stack[p+1]) + stack[p], p = S-2 .. 0.
    def bwd(j, state):
        pos = S - 2 - j
        new = apply_f(state) + o_ref[pos]
        o_ref[pos] = new
        return new

    jax.lax.fori_loop(0, S - 1, bwd, last)


def _round_up(x, m):
    return -(-x // m) * m


def _pick_batch_block(n, l, target_lanes=1024):
    cap = max(1, target_lanes // max(l, 1))
    for nb in range(min(n, cap), 0, -1):
        if n % nb == 0:
            return nb
    return 1


def directional_conv(x, weight, bias, direction="vertical", batch_block=None):
    """Forward pass of DirectionalConvLayer.

    x: (N, C, H, W) float32.  weight: (C, C, KH, KW).  bias: (C,).
    """
    x = x.astype(jnp.float32)
    weight = weight.astype(jnp.float32)
    bias = bias.astype(jnp.float32)
    N, C, H, W = x.shape
    KH, KW = int(weight.shape[2]), int(weight.shape[3])

    if direction == "vertical":
        S, L, K = H, W, KW
        w_eff = weight[:, :, (KH - 1) // 2, :]          # (C, C, KW) center row
        x_t = jnp.transpose(x, (2, 1, 0, 3))            # (S, C, N, L)
    elif direction == "horizontal":
        S, L, K = W, H, KH
        w_eff = weight[:, :, :, (KW - 1) // 2]          # (C, C, KH) center column
        x_t = jnp.transpose(x, (3, 1, 0, 2))            # (S, C, N, L)
    else:
        raise ValueError(f"unknown direction: {direction}")
    pad = (K - 1) // 2

    if batch_block is None:
        batch_block = _pick_batch_block(N, L)
    nb = int(batch_block)
    if N % nb != 0:
        raise ValueError(f"batch_block={nb} must divide batch size N={N}")
    NB = N // nb

    Cp = _round_up(max(C, 8), 8)            # channels -> sublane multiple
    nl = nb * L
    NLp = _round_up(max(nl, 128), 128)      # lanes    -> 128 multiple

    # (S, C, N, L) -> (NB, S, Cp, NLp): fold (batch_block, L) into lanes, pad.
    x_t = x_t.reshape(S, C, NB, nb, L)
    x_t = jnp.transpose(x_t, (2, 0, 1, 3, 4)).reshape(NB, S, C, nl)
    x_t = jnp.pad(x_t, ((0, 0), (0, 0), (0, Cp - C), (0, NLp - nl)))

    # Per-tap channel-mix matrices: w_taps[k][o, c] = w_eff[o, c, k], zero-padded.
    w_taps = jnp.transpose(w_eff, (2, 0, 1))                        # (K, C, C)
    w_taps = jnp.pad(w_taps, ((0, 0), (0, Cp - C), (0, Cp - C)))    # (K, Cp, Cp)

    # Lane bookkeeping on the padded lane axis: one segment per batch element.
    idx = jnp.arange(NLp)
    seg_id = idx // L
    valid = idx < nl
    same_seg = (seg_id[:, None] == seg_id[None, :]) & valid[:, None] & valid[None, :]
    # Segment-mean matrix: (y @ m_mat)[., l] = mean of y over l's segment.
    m_mat = same_seg.astype(jnp.float32) / float(L)
    # Per-tap shift matrices: (y @ sh[k])[., l] = y[., l + k - pad] if that index
    # stays inside l's segment, else 0 ('same' zero padding, no batch leakage).
    sh_taps = jnp.stack(
        [((idx[:, None] == idx[None, :] + (k - pad)) & same_seg).astype(jnp.float32)
         for k in range(K)], axis=0)                                # (K, NLp, NLp)

    # Bias pre-broadcast (zero at pad lanes / pad channels).  NOTE: with
    # affine-free InstanceNorm the bias is mathematically cancelled by the mean
    # subtraction; kept for transparency (one hoisted add).
    bias_b = jnp.where(valid[None, :], jnp.pad(bias, (0, Cp - C))[:, None], 0.0)

    out_t = pl.pallas_call(
        _dir_scan_kernel,
        out_shape=jax.ShapeDtypeStruct((NB, S, Cp, NLp), jnp.float32),
        grid=(NB,),
        in_specs=[
            pl.BlockSpec((None, S, Cp, NLp), lambda g: (g, 0, 0, 0)),
            pl.BlockSpec((K, Cp, Cp), lambda g: (0, 0, 0)),
            pl.BlockSpec((Cp, NLp), lambda g: (0, 0)),
            pl.BlockSpec((K, NLp, NLp), lambda g: (0, 0, 0)),
            pl.BlockSpec((NLp, NLp), lambda g: (0, 0)),
        ],
        out_specs=pl.BlockSpec((None, S, Cp, NLp), lambda g: (g, 0, 0, 0)),
        compiler_params=pltpu.CompilerParams(
            dimension_semantics=("parallel",),
            vmem_limit_bytes=32 * 1024 * 1024,
        ),
    )(x_t, w_taps, bias_b, sh_taps, m_mat)

    # (NB, S, Cp, NLp) -> (N, C, S, L) -> (N, C, H, W)
    out_t = out_t[:, :, :C, :nl].reshape(NB, S, C, nb, L)
    out_t = jnp.transpose(out_t, (0, 3, 2, 1, 4)).reshape(N, C, S, L)
    if direction == "vertical":
        return out_t
    return jnp.transpose(out_t, (0, 1, 3, 2))


# ---------------- pure-JAX reference (full Conv2d semantics) ----------------
def _ref_block(t, weight, bias):
    pad_h = (weight.shape[2] - 1) // 2
    pad_w = (weight.shape[3] - 1) // 2
    y = jax.lax.conv_general_dilated(
        t, weight, (1, 1), ((pad_h, pad_h), (pad_w, pad_w)),
        dimension_numbers=("NCHW", "OIHW", "NCHW"),
        precision=jax.lax.Precision.HIGHEST)
    y = y + bias[None, :, None, None]
    m = y.mean(axis=(2, 3), keepdims=True)
    v = ((y - m) ** 2).mean(axis=(2, 3), keepdims=True)
    y = (y - m) * jax.lax.rsqrt(v + 1e-5)
    return jnp.where(y > 0, y, jnp.expm1(y))


def directional_conv_reference(x, weight, bias, direction="vertical"):
    n, c, h, w = x.shape
    f = functools.partial(_ref_block, weight=weight, bias=bias)
    stack = []
    if direction == "vertical":
        for i in range(h):
            fi = x[:, :, i:i + 1, :]
            stack.append(fi if i == 0 else f(stack[i - 1]) + fi)
        for i in range(h):
            pos = h - i - 1
            if pos == h - 1:
                continue
            stack[pos] = f(stack[pos + 1]) + stack[pos]
        return jnp.concatenate(stack, axis=2)
    else:
        for i in range(w):
            fi = x[:, :, :, i:i + 1]
            stack.append(fi if i == 0 else f(stack[i - 1]) + fi)
        for i in range(w):
            pos = w - i - 1
            if pos == w - 1:
                continue
            stack[pos] = f(stack[pos + 1]) + stack[pos]
        return jnp.concatenate(stack, axis=3)


if __name__ == "__main__":
    key = jax.random.PRNGKey(0)
    kx, kwv, kbv, kwh, kbh = jax.random.split(key, 5)

    N, C, H, W = 2, 4, 16, 16
    KH = KW = 3

    x = jax.random.normal(kx, (N, C, H, W), dtype=jnp.float32)
    w_vert = 0.3 * jax.random.normal(kwv, (C, C, KH, KW), dtype=jnp.float32)
    b_vert = 0.1 * jax.random.normal(kbv, (C,), dtype=jnp.float32)
    w_horz = 0.3 * jax.random.normal(kwh, (C, C, KH, KW), dtype=jnp.float32)
    b_horz = 0.1 * jax.random.normal(kbh, (C,), dtype=jnp.float32)

    ok = True
    for direction, wgt, bia in (("vertical", w_vert, b_vert),
                                ("horizontal", w_horz, b_horz)):
        ref = jax.block_until_ready(
            directional_conv_reference(x, wgt, bia, direction=direction))
        # batch_block=1 exercises the multi-block "parallel" grid path
        # (2 grid steps); batch_block=2 runs the whole batch in one block.
        for bb in (1, 2):
            out = jax.block_until_ready(
                directional_conv(x, wgt, bia, direction=direction,
                                 batch_block=bb))
            err = float(jnp.max(jnp.abs(out - ref)))
            if not (out.shape == (N, C, H, W) and err < 2e-3):
                ok = False
                print(f"MISMATCH direction={direction} batch_block={bb} "
                      f"max_abs_err={err}")

    if ok:
        print("KERNEL_OK")
</pallas_src>

<mosaic_0001>
module attributes {stable_mosaic.version = 11 : i64} {
  func.func @_dir_scan_kernel(%arg0: i32, %arg1: memref<1x16x8x128xf32, #tpu.memory_space<vmem>>, %arg2: memref<3x8x8xf32, #tpu.memory_space<vmem>>, %arg3: memref<8x128xf32, #tpu.memory_space<vmem>>, %arg4: memref<3x128x128xf32, #tpu.memory_space<vmem>>, %arg5: memref<128x128xf32, #tpu.memory_space<vmem>>, %arg6: memref<1x16x8x128xf32, #tpu.memory_space<vmem>>) attributes {dimension_semantics = [#tpu.dimension_semantics<parallel>], iteration_bounds = array<i64: 2>, scalar_prefetch = 0 : i64, scratch_operands = 0 : i64, tpu.core_type = #tpu.core_type<tc>, window_params = [{transform_indices = @transform_0, window_bounds = array<i64: 1, 16, 8, 128>}, {pipeline_mode = #tpu.pipeline_mode<synchronous>, transform_indices = @transform_1, window_bounds = array<i64: 3, 8, 8>}, {pipeline_mode = #tpu.pipeline_mode<synchronous>, transform_indices = @transform_2, window_bounds = array<i64: 8, 128>}, {pipeline_mode = #tpu.pipeline_mode<synchronous>, transform_indices = @transform_3, window_bounds = array<i64: 3, 128, 128>}, {pipeline_mode = #tpu.pipeline_mode<synchronous>, transform_indices = @transform_4, window_bounds = array<i64: 128, 128>}, {transform_indices = @transform_5, window_bounds = array<i64: 1, 16, 8, 128>}]} {
    %c0 = arith.constant 0 : index
    %c0_0 = arith.constant 0 : index
    %c0_1 = arith.constant 0 : index
    %0 = vector.load %arg2[%c0, %c0_0, %c0_1] : memref<3x8x8xf32, #tpu.memory_space<vmem>>, vector<1x8x8xf32>
    %1 = vector.shape_cast %0 : vector<1x8x8xf32> to vector<8x8xf32>
    %c1 = arith.constant 1 : index
    %c0_2 = arith.constant 0 : index
    %c0_3 = arith.constant 0 : index
    %2 = vector.load %arg2[%c1, %c0_2, %c0_3] : memref<3x8x8xf32, #tpu.memory_space<vmem>>, vector<1x8x8xf32>
    %3 = vector.shape_cast %2 : vector<1x8x8xf32> to vector<8x8xf32>
    %c2 = arith.constant 2 : index
    %c0_4 = arith.constant 0 : index
    %c0_5 = arith.constant 0 : index
    %4 = vector.load %arg2[%c2, %c0_4, %c0_5] : memref<3x8x8xf32, #tpu.memory_space<vmem>>, vector<1x8x8xf32>
    %5 = vector.shape_cast %4 : vector<1x8x8xf32> to vector<8x8xf32>
    %c0_6 = arith.constant 0 : index
    %c0_7 = arith.constant 0 : index
    %6 = vector.load %arg3[%c0_6, %c0_7] : memref<8x128xf32, #tpu.memory_space<vmem>>, vector<8x128xf32>
    %c0_8 = arith.constant 0 : index
    %c0_9 = arith.constant 0 : index
    %c0_10 = arith.constant 0 : index
    %c0_11 = arith.constant 0 : index
    %7 = vector.load %arg1[%c0_8, %c0_9, %c0_10, %c0_11] : memref<1x16x8x128xf32, #tpu.memory_space<vmem>>, vector<1x1x8x128xf32>
    %8 = vector.shape_cast %7 : vector<1x1x8x128xf32> to vector<8x128xf32>
    %c0_12 = arith.constant 0 : index
    %c0_13 = arith.constant 0 : index
    %c0_14 = arith.constant 0 : index
    %c0_15 = arith.constant 0 : index
    %9 = vector.load %arg6[%c0_12, %c0_13, %c0_14, %c0_15] : memref<1x16x8x128xf32, #tpu.memory_space<vmem>>, vector<1x1x8x128xf32>
    %10 = vector.shape_cast %9 : vector<1x1x8x128xf32> to vector<8x128xf32>
    %11 = vector.shape_cast %8 : vector<8x128xf32> to vector<1x1x8x128xf32>
    tpu.vector_store %arg6[%c0_12, %c0_13, %c0_14, %c0_15], %11 {strides = array<i32>} : memref<1x16x8x128xf32, #tpu.memory_space<vmem>>, vector<1x1x8x128xf32>,
    %c1_i32 = arith.constant 1 : i32
    %c15_i32 = arith.constant 15 : i32
    %12 = arith.addi %c1_i32, %c15_i32 : i32
    %c1_i32_16 = arith.constant 1 : i32
    %13 = scf.for %arg7 = %c1_i32 to %12 step %c1_i32_16 iter_args(%arg8 = %8) -> (vector<8x128xf32>)  : i32 {
      %cst = arith.constant dense<0.000000e+00> : vector<8x128xf32>
      %16 = tpu.matmul %1, %arg8, %cst {dimension_numbers = #tpu.dot_dimension_numbers<[1], [0], [0], [1], [0, 0, 1, 1], [], []>} : vector<8x8xf32>, vector<8x128xf32>, vector<8x128xf32> -> vector<8x128xf32>
      %c0_21 = arith.constant 0 : index
      %c0_22 = arith.constant 0 : index
      %c0_23 = arith.constant 0 : index
      %17 = vector.load %arg4[%c0_21, %c0_22, %c0_23] : memref<3x128x128xf32, #tpu.memory_space<vmem>>, vector<1x128x128xf32>
      %18 = vector.shape_cast %17 : vector<1x128x128xf32> to vector<128x128xf32>
      %cst_24 = arith.constant dense<0.000000e+00> : vector<8x128xf32>
      %19 = tpu.matmul %16, %18, %cst_24 {dimension_numbers = #tpu.dot_dimension_numbers<[1], [0], [0], [1], [0, 0, 1, 1], [], []>} : vector<8x128xf32>, vector<128x128xf32>, vector<8x128xf32> -> vector<8x128xf32>
      %20 = arith.addf %6, %19 : vector<8x128xf32>
      %cst_25 = arith.constant dense<0.000000e+00> : vector<8x128xf32>
      %21 = tpu.matmul %3, %arg8, %cst_25 {dimension_numbers = #tpu.dot_dimension_numbers<[1], [0], [0], [1], [0, 0, 1, 1], [], []>} : vector<8x8xf32>, vector<8x128xf32>, vector<8x128xf32> -> vector<8x128xf32>
      %c1_26 = arith.constant 1 : index
      %c0_27 = arith.constant 0 : index
      %c0_28 = arith.constant 0 : index
      %22 = vector.load %arg4[%c1_26, %c0_27, %c0_28] : memref<3x128x128xf32, #tpu.memory_space<vmem>>, vector<1x128x128xf32>
      %23 = vector.shape_cast %22 : vector<1x128x128xf32> to vector<128x128xf32>
      %cst_29 = arith.constant dense<0.000000e+00> : vector<8x128xf32>
      %24 = tpu.matmul %21, %23, %cst_29 {dimension_numbers = #tpu.dot_dimension_numbers<[1], [0], [0], [1], [0, 0, 1, 1], [], []>} : vector<8x128xf32>, vector<128x128xf32>, vector<8x128xf32> -> vector<8x128xf32>
      %25 = arith.addf %20, %24 : vector<8x128xf32>
      %cst_30 = arith.constant dense<0.000000e+00> : vector<8x128xf32>
      %26 = tpu.matmul %5, %arg8, %cst_30 {dimension_numbers = #tpu.dot_dimension_numbers<[1], [0], [0], [1], [0, 0, 1, 1], [], []>} : vector<8x8xf32>, vector<8x128xf32>, vector<8x128xf32> -> vector<8x128xf32>
      %c2_31 = arith.constant 2 : index
      %c0_32 = arith.constant 0 : index
      %c0_33 = arith.constant 0 : index
      %27 = vector.load %arg4[%c2_31, %c0_32, %c0_33] : memref<3x128x128xf32, #tpu.memory_space<vmem>>, vector<1x128x128xf32>
      %28 = vector.shape_cast %27 : vector<1x128x128xf32> to vector<128x128xf32>
      %cst_34 = arith.constant dense<0.000000e+00> : vector<8x128xf32>
      %29 = tpu.matmul %26, %28, %cst_34 {dimension_numbers = #tpu.dot_dimension_numbers<[1], [0], [0], [1], [0, 0, 1, 1], [], []>} : vector<8x128xf32>, vector<128x128xf32>, vector<8x128xf32> -> vector<8x128xf32>
      %30 = arith.addf %25, %29 : vector<8x128xf32>
      %c0_35 = arith.constant 0 : index
      %c0_36 = arith.constant 0 : index
      %31 = vector.load %arg5[%c0_35, %c0_36] : memref<128x128xf32, #tpu.memory_space<vmem>>, vector<128x128xf32>
      %cst_37 = arith.constant dense<0.000000e+00> : vector<8x128xf32>
      %32 = tpu.matmul %30, %31, %cst_37 {dimension_numbers = #tpu.dot_dimension_numbers<[1], [0], [0], [1], [0, 0, 1, 1], [], []>} : vector<8x128xf32>, vector<128x128xf32>, vector<8x128xf32> -> vector<8x128xf32>
      %33 = arith.subf %30, %32 : vector<8x128xf32>
      %34 = arith.mulf %33, %33 : vector<8x128xf32>
      %cst_38 = arith.constant dense<0.000000e+00> : vector<8x128xf32>
      %35 = tpu.matmul %34, %31, %cst_38 {dimension_numbers = #tpu.dot_dimension_numbers<[1], [0], [0], [1], [0, 0, 1, 1], [], []>} : vector<8x128xf32>, vector<128x128xf32>, vector<8x128xf32> -> vector<8x128xf32>
      %cst_39 = arith.constant 9.99999974E-6 : f32
      %36 = vector.broadcast %cst_39 : f32 to vector<8x128xf32>
      %37 = arith.addf %35, %36 : vector<8x128xf32>
      %38 = math.rsqrt %37 : vector<8x128xf32>
      %39 = arith.mulf %33, %38 : vector<8x128xf32>
      %cst_40 = arith.constant 0.000000e+00 : f32
      %40 = vector.broadcast %cst_40 : f32 to vector<8x128xf32>
      %41 = arith.cmpf ogt, %39, %40 : vector<8x128xf32>
      %cst_41 = arith.constant 0.000000e+00 : f32
      %42 = vector.broadcast %cst_41 : f32 to vector<8x128xf32>
      %43 = arith.minimumf %39, %42 : vector<8x128xf32>
      %44 = math.exp %43 : vector<8x128xf32>
      %cst_42 = arith.constant 1.000000e+00 : f32
      %45 = vector.broadcast %cst_42 : f32 to vector<8x128xf32>
      %46 = arith.subf %44, %45 : vector<8x128xf32>
      %47 = arith.select %41, %39, %46 : vector<8x128xi1>, vector<8x128xf32>
      %c0_43 = arith.constant 0 : index
      %48 = arith.index_cast %arg7 : i32 to index
      %c0_44 = arith.constant 0 : index
      %c0_45 = arith.constant 0 : index
      %49 = vector.load %arg1[%c0_43, %48, %c0_44, %c0_45] : memref<1x16x8x128xf32, #tpu.memory_space<vmem>>, vector<1x1x8x128xf32>
      %50 = vector.shape_cast %49 : vector<1x1x8x128xf32> to vector<8x128xf32>
      %51 = arith.addf %47, %50 : vector<8x128xf32>
      %c0_46 = arith.constant 0 : index
      %52 = arith.index_cast %arg7 : i32 to index
      %c0_47 = arith.constant 0 : index
      %c0_48 = arith.constant 0 : index
      %53 = vector.load %arg6[%c0_46, %52, %c0_47, %c0_48] : memref<1x16x8x128xf32, #tpu.memory_space<vmem>>, vector<1x1x8x128xf32>
      %54 = vector.shape_cast %53 : vector<1x1x8x128xf32> to vector<8x128xf32>
      %55 = vector.shape_cast %51 : vector<8x128xf32> to vector<1x1x8x128xf32>
      tpu.vector_store %arg6[%c0_46, %52, %c0_47, %c0_48], %55 {strides = array<i32>} : memref<1x16x8x128xf32, #tpu.memory_space<vmem>>, vector<1x1x8x128xf32>,
      scf.yield %51 : vector<8x128xf32>
    }
    %c15_i32_17 = arith.constant 15 : i32
    %c0_i32 = arith.constant 0 : i32
    %c15_i32_18 = arith.constant 15 : i32
    %14 = arith.addi %c0_i32, %c15_i32_18 : i32
    %c1_i32_19 = arith.constant 1 : i32
    %15 = scf.for %arg7 = %c0_i32 to %14 step %c1_i32_19 iter_args(%arg8 = %13) -> (vector<8x128xf32>)  : i32 {
      %c14_i32 = arith.constant 14 : i32
      %16 = arith.subi %c14_i32, %arg7 : i32
      %cst = arith.constant dense<0.000000e+00> : vector<8x128xf32>
      %17 = tpu.matmul %1, %arg8, %cst {dimension_numbers = #tpu.dot_dimension_numbers<[1], [0], [0], [1], [0, 0, 1, 1], [], []>} : vector<8x8xf32>, vector<8x128xf32>, vector<8x128xf32> -> vector<8x128xf32>
      %c0_21 = arith.constant 0 : index
      %c0_22 = arith.constant 0 : index
      %c0_23 = arith.constant 0 : index
      %18 = vector.load %arg4[%c0_21, %c0_22, %c0_23] : memref<3x128x128xf32, #tpu.memory_space<vmem>>, vector<1x128x128xf32>
      %19 = vector.shape_cast %18 : vector<1x128x128xf32> to vector<128x128xf32>
      %cst_24 = arith.constant dense<0.000000e+00> : vector<8x128xf32>
      %20 = tpu.matmul %17, %19, %cst_24 {dimension_numbers = #tpu.dot_dimension_numbers<[1], [0], [0], [1], [0, 0, 1, 1], [], []>} : vector<8x128xf32>, vector<128x128xf32>, vector<8x128xf32> -> vector<8x128xf32>
      %21 = arith.addf %6, %20 : vector<8x128xf32>
      %cst_25 = arith.constant dense<0.000000e+00> : vector<8x128xf32>
      %22 = tpu.matmul %3, %arg8, %cst_25 {dimension_numbers = #tpu.dot_dimension_numbers<[1], [0], [0], [1], [0, 0, 1, 1], [], []>} : vector<8x8xf32>, vector<8x128xf32>, vector<8x128xf32> -> vector<8x128xf32>
      %c1_26 = arith.constant 1 : index
      %c0_27 = arith.constant 0 : index
      %c0_28 = arith.constant 0 : index
      %23 = vector.load %arg4[%c1_26, %c0_27, %c0_28] : memref<3x128x128xf32, #tpu.memory_space<vmem>>, vector<1x128x128xf32>
      %24 = vector.shape_cast %23 : vector<1x128x128xf32> to vector<128x128xf32>
      %cst_29 = arith.constant dense<0.000000e+00> : vector<8x128xf32>
      %25 = tpu.matmul %22, %24, %cst_29 {dimension_numbers = #tpu.dot_dimension_numbers<[1], [0], [0], [1], [0, 0, 1, 1], [], []>} : vector<8x128xf32>, vector<128x128xf32>, vector<8x128xf32> -> vector<8x128xf32>
      %26 = arith.addf %21, %25 : vector<8x128xf32>
      %cst_30 = arith.constant dense<0.000000e+00> : vector<8x128xf32>
      %27 = tpu.matmul %5, %arg8, %cst_30 {dimension_numbers = #tpu.dot_dimension_numbers<[1], [0], [0], [1], [0, 0, 1, 1], [], []>} : vector<8x8xf32>, vector<8x128xf32>, vector<8x128xf32> -> vector<8x128xf32>
      %c2_31 = arith.constant 2 : index
      %c0_32 = arith.constant 0 : index
      %c0_33 = arith.constant 0 : index
      %28 = vector.load %arg4[%c2_31, %c0_32, %c0_33] : memref<3x128x128xf32, #tpu.memory_space<vmem>>, vector<1x128x128xf32>
      %29 = vector.shape_cast %28 : vector<1x128x128xf32> to vector<128x128xf32>
      %cst_34 = arith.constant dense<0.000000e+00> : vector<8x128xf32>
      %30 = tpu.matmul %27, %29, %cst_34 {dimension_numbers = #tpu.dot_dimension_numbers<[1], [0], [0], [1], [0, 0, 1, 1], [], []>} : vector<8x128xf32>, vector<128x128xf32>, vector<8x128xf32> -> vector<8x128xf32>
      %31 = arith.addf %26, %30 : vector<8x128xf32>
      %c0_35 = arith.constant 0 : index
      %c0_36 = arith.constant 0 : index
      %32 = vector.load %arg5[%c0_35, %c0_36] : memref<128x128xf32, #tpu.memory_space<vmem>>, vector<128x128xf32>
      %cst_37 = arith.constant dense<0.000000e+00> : vector<8x128xf32>
      %33 = tpu.matmul %31, %32, %cst_37 {dimension_numbers = #tpu.dot_dimension_numbers<[1], [0], [0], [1], [0, 0, 1, 1], [], []>} : vector<8x128xf32>, vector<128x128xf32>, vector<8x128xf32> -> vector<8x128xf32>
      %34 = arith.subf %31, %33 : vector<8x128xf32>
      %35 = arith.mulf %34, %34 : vector<8x128xf32>
      %cst_38 = arith.constant dense<0.000000e+00> : vector<8x128xf32>
      %36 = tpu.matmul %35, %32, %cst_38 {dimension_numbers = #tpu.dot_dimension_numbers<[1], [0], [0], [1], [0, 0, 1, 1], [], []>} : vector<8x128xf32>, vector<128x128xf32>, vector<8x128xf32> -> vector<8x128xf32>
      %cst_39 = arith.constant 9.99999974E-6 : f32
      %37 = vector.broadcast %cst_39 : f32 to vector<8x128xf32>
      %38 = arith.addf %36, %37 : vector<8x128xf32>
      %39 = math.rsqrt %38 : vector<8x128xf32>
      %40 = arith.mulf %34, %39 : vector<8x128xf32>
      %cst_40 = arith.constant 0.000000e+00 : f32
      %41 = vector.broadcast %cst_40 : f32 to vector<8x128xf32>
      %42 = arith.cmpf ogt, %40, %41 : vector<8x128xf32>
      %cst_41 = arith.constant 0.000000e+00 : f32
      %43 = vector.broadcast %cst_41 : f32 to vector<8x128xf32>
      %44 = arith.minimumf %40, %43 : vector<8x128xf32>
      %45 = math.exp %44 : vector<8x128xf32>
      %cst_42 = arith.constant 1.000000e+00 : f32
      %46 = vector.broadcast %cst_42 : f32 to vector<8x128xf32>
      %47 = arith.subf %45, %46 : vector<8x128xf32>
      %48 = arith.select %42, %40, %47 : vector<8x128xi1>, vector<8x128xf32>
      %c0_43 = arith.constant 0 : index
      %49 = arith.index_cast %16 : i32 to index
      %c0_44 = arith.constant 0 : index
      %c0_45 = arith.constant 0 : index
      %50 = vector.load %arg6[%c0_43, %49, %c0_44, %c0_45] : memref<1x16x8x128xf32, #tpu.memory_space<vmem>>, vector<1x1x8x128xf32>
      %51 = vector.shape_cast %50 : vector<1x1x8x128xf32> to vector<8x128xf32>
      %52 = arith.addf %48, %51 : vector<8x128xf32>
      %c0_46 = arith.constant 0 : index
      %53 = arith.index_cast %16 : i32 to index
      %c0_47 = arith.constant 0 : index
      %c0_48 = arith.constant 0 : index
      %54 = vector.load %arg6[%c0_46, %53, %c0_47, %c0_48] : memref<1x16x8x128xf32, #tpu.memory_space<vmem>>, vector<1x1x8x128xf32>
      %55 = vector.shape_cast %54 : vector<1x1x8x128xf32> to vector<8x128xf32>
      %56 = vector.shape_cast %52 : vector<8x128xf32> to vector<1x1x8x128xf32>
      tpu.vector_store %arg6[%c0_46, %53, %c0_47, %c0_48], %56 {strides = array<i32>} : memref<1x16x8x128xf32, #tpu.memory_space<vmem>>, vector<1x1x8x128xf32>,
      scf.yield %52 : vector<8x128xf32>
    }
    %c15_i32_20 = arith.constant 15 : i32
    return
  }
  func.func @transform_0(%arg0: i32) -> (i32, i32, i32, i32) {
    %c0_i32 = arith.constant 0 : i32
    %c0_i32_0 = arith.constant 0 : i32
    %c0_i32_1 = arith.constant 0 : i32
    %c0_i32_2 = arith.constant 0 : i32
    return %arg0, %c0_i32, %c0_i32_0, %c0_i32_1 : i32, i32, i32, i32
  }
  func.func @transform_1(%arg0: i32) -> (i32, i32, i32) {
    %c0_i32 = arith.constant 0 : i32
    %c0_i32_0 = arith.constant 0 : i32
    %c0_i32_1 = arith.constant 0 : i32
    %c0_i32_2 = arith.constant 0 : i32
    return %c0_i32, %c0_i32_0, %c0_i32_1 : i32, i32, i32
  }
  func.func @transform_2(%arg0: i32) -> (i32, i32) {
    %c0_i32 = arith.constant 0 : i32
    %c0_i32_0 = arith.constant 0 : i32
    %c0_i32_1 = arith.constant 0 : i32
    return %c0_i32, %c0_i32_0 : i32, i32
  }
  func.func @transform_3(%arg0: i32) -> (i32, i32, i32) {
    %c0_i32 = arith.constant 0 : i32
    %c0_i32_0 = arith.constant 0 : i32
    %c0_i32_1 = arith.constant 0 : i32
    %c0_i32_2 = arith.constant 0 : i32
    return %c0_i32, %c0_i32_0, %c0_i32_1 : i32, i32, i32
  }
  func.func @transform_4(%arg0: i32) -> (i32, i32) {
    %c0_i32 = arith.constant 0 : i32
    %c0_i32_0 = arith.constant 0 : i32
    %c0_i32_1 = arith.constant 0 : i32
    return %c0_i32, %c0_i32_0 : i32, i32
  }
  func.func @transform_5(%arg0: i32) -> (i32, i32, i32, i32) {
    %c0_i32 = arith.constant 0 : i32
    %c0_i32_0 = arith.constant 0 : i32
    %c0_i32_1 = arith.constant 0 : i32
    %c0_i32_2 = arith.constant 0 : i32
    return %arg0, %c0_i32, %c0_i32_0, %c0_i32_1 : i32, i32, i32, i32
  }
}

</mosaic_0001>

<bundles_post_ra>
// kernel: tpu_custom_call.1
= control target key start
LH: loop header
LB: loop body
LE: loop exit
PB: predicated region body
PF: predicated region fallthrough
CT: control target
= control target key end

     0   :  { %10 = vsyncpa [#allocation3], 0  ;;  %s3586_s0 = inlined_call_operand.hbm [shape: f32[2,16,8,128], index: 0, kind: input, shape index: {}]   ;;  %s3587_s1 = inlined_call_operand.hbm [shape: f32[3,8,8], index: 1, kind: input, shape index: {}]   ;;  %s3588_s2 = inlined_call_operand.hbm [shape: f32[8,128], index: 2, kind: input, shape index: {}]   ;;  %s3589_s3 = inlined_call_operand.hbm [shape: f32[3,128,128], index: 3, kind: input, shape index: {}]   ;;  %s3590_s4 = inlined_call_operand.hbm [shape: f32[128,128], index: 4, kind: input, shape index: {}]   ;;  %s3591_s5 = inlined_call_operand.hbm [shape: f32[2,16,8,128], index: 5, kind: output, shape index: {}]  }
   0x1   :  { %12 = vsyncpa [#allocation3 + $0x1], 0 }
   0x2   :  { %13 = vsyncpa [#allocation6], 0 }
   0x3   :  { %14 = vsyncpa [#allocation9], 0 }
   0x4   :  { %15 = vsyncpa [#allocation4], 0 }
   0x5   :  { %17 = vsyncpa [#allocation4 + $0x1], 0  ;;  %s3057_s18 = smov 0   ;;  %s3059_s19 = smov 0  }
   0x6   :  { %s3061_s20 = smov 0   ;;  %s3063_s21 = smov 0  }
   0x7 LB: > { %s3078_s22 = sadd.s32 4294967295, %s2993_s21   ;;  %s1778_s23 = sadd.s32 4294967294, %s2993_s21   ;;  %s2993_s21 = sphi %s3063_s21, %s3615_s21   ;;  %s2989_s20 = sphi %s3061_s20, %s3614_s20   ;;  %s2985_s19 = sphi %s3059_s19, %s3613_s19   ;;  %s2981_s18 = sphi %s3057_s18, %s3612_s18  }
   0x8   : > { %p43_p0 = scmp.ne.s32.totalorder %s2985_s19, %s2981_s18  ;;  %p3592_p1 = scmp.eq.s32.totalorder %s3078_s22, 0 }
   0x9   : > { %p157_p3 = scmp.eq.s32.totalorder %s1778_s23, 1  ;;  %p1779_p5 = scmp.ge.s32.totalorder %s2993_s21, 1 }
   0xa   : > { %p3087_p4 = por %p3592_p1, %p43_p0  ;;  %p164_p7 = scmp.lt.s32.totalorder %s2993_s21, 3 }
   0xb   : > { %p3092_p6 = por %p157_p3, %p43_p0  ;;  %s3011_s27 = smov [#allocation5]  }
   0xc   : > { %s3595_s24 = scalar_select %p3087_p4, 1, 0 }
   0xd   : > { %s3596_s25 = scalar_select %p3092_p6, 1, 0 }
   0xe   : > { %p3097_p8 = pnand %p1779_p5, %p164_p7  ;;  %s176_s28 = sshll.u32 %s3011_s27, 4  ;;  %s3101_s28 = int_to_ptr.vmem [resolvable:$true] %s176_s28 }
   0xf   : > { %s3012_s30 = smov [#allocation8]   ;;  %s3013_s7 = smov [#allocation7]  }
  0x10   : > { %s3597_s26 = scalar_select %p3097_p8, 1, 0 }
  0x11   : > { %p2644_p9 = pneg %p3097_p8  ;;  %s200_s6 = sshll.u32 %s3012_s30, 4  ;;  %s3112_s6 = int_to_ptr.vmem [resolvable:$true] %s200_s6 }
  0x12   : > { %s3114_s8 = sshll.u32 %s3013_s7, 4  ;;  %s2761_s11 = scalar_lea.hbm %s3587_s1, 384  ;;  %s191_s8 = int_to_ptr.vmem [resolvable:$true] %s3114_s8 }
  0x13   : > { %p3108_p11 = pnand %p2644_p9, %p3592_p1  ;;  %p2762_p12 = scmp.ne.s32.totalorder %s3587_s1, %s2761_s11 }
  0x14   : > { %p2768_p5 = scmp.lt.u32.totalorder %s2761_s11, %s3587_s1 }
  0x15   : > { %p3124_p13 = pneg %p3108_p11 }
  0x17   : > { %p2764_p0 = pnand %p3124_p13, %p2762_p12 }
  0x19   : > { %p2765_p3 = pneg %p2764_p0 }
  0x1b   : > { %p2770_p7 = pnand %p2768_p5, %p2765_p3 }
  0x1d   : > { %2773 = shalt.err (!%p2770_p7)
}
  0x1e   : > { %s2774_s17 = scalar_lea.vmem %s3101_s28, 384  ;;  %p2782_p2 = scmp.lt.s32.totalorder %s3101_s28, %s3101_s28 }
  0x1f   : > { %p2775_p9 = scmp.ne.s32.totalorder %s3101_s28, %s2774_s17  ;;  %p2783_p6 = scmp.lt.s32.totalorder %s2774_s17, %s2774_s17 }
  0x21   : > { %p2777_p10 = pnand %p2775_p9, %p3124_p13  ;;  %p2784_p12 = por %p2783_p6, %p2782_p2 }
  0x23   : > { %p2778_p1 = pneg %p2777_p10 }
  0x25   : > { %p2785_p0 = pnand %p2784_p12, %p2778_p1 }
  0x27   : > { %2788 = shalt.err (!%p2785_p0)
}
  0x28   : > { %s3014_s23 = smov 128   ;;  %s3015_s27 = smov 8  }
  0x29   : > { %2647 = dma.hbm_to_vmem [thread:$0]  (!%p3108_p11), %s3587_s1, 384, %s3101_s28, [#allocation6], %s3014_s23, %s3014_s23, %s3015_s27  }
  0x2a   : > { %s2789_s11 = scalar_lea.hbm %s3589_s3, 6144 }
  0x2b   : > { %p2790_p1 = scmp.ne.s32.totalorder %s3589_s3, %s2789_s11  ;;  %p2796_p10 = scmp.lt.u32.totalorder %s2789_s11, %s3589_s3 }
  0x2d   : > { %p2792_p2 = pnand %p2790_p1, %p3124_p13 }
  0x2f   : > { %p2793_p6 = pneg %p2792_p2 }
  0x31   : > { %p2798_p3 = pnand %p2796_p10, %p2793_p6 }
  0x33   : > { %2801 = shalt.err (!%p2798_p3)
}
  0x34   : > { %s2802_s28 = scalar_lea.vmem %s3112_s6, 6144  ;;  %p2810_p12 = scmp.lt.s32.totalorder %s3112_s6, %s3112_s6 }
  0x35   : > { %p2803_p5 = scmp.ne.s32.totalorder %s3112_s6, %s2802_s28  ;;  %p2811_p0 = scmp.lt.s32.totalorder %s2802_s28, %s2802_s28 }
  0x37   : > { %p2805_p7 = pnand %p2803_p5, %p3124_p13  ;;  %p2812_p1 = por %p2811_p0, %p2810_p12 }
  0x39   : > { %p2806_p9 = pneg %p2805_p7 }
  0x3b   : > { %p2813_p2 = pnand %p2812_p1, %p2806_p9 }
  0x3d   : > { %2816 = shalt.err (!%p2813_p2)
}
  0x3e   : > { %2653 = dma.hbm_to_vmem [thread:$0]  (!%p3108_p11), %s3589_s3, 6144, %s3112_s6, [#allocation9], %s3014_s23, %s3014_s23, %s3015_s27  }
  0x3f   : > { %s2817_s10 = scalar_lea.hbm %s3588_s2, 128 }
  0x40   : > { %p2818_p6 = scmp.ne.s32.totalorder %s3588_s2, %s2817_s10  ;;  %p2824_p5 = scmp.lt.u32.totalorder %s2817_s10, %s3588_s2 }
  0x42   : > { %p2820_p10 = pnand %p2818_p6, %p3124_p13 }
  0x44   : > { %p2821_p3 = pneg %p2820_p10 }
  0x46   : > { %p2826_p7 = pnand %p2824_p5, %p2821_p3 }
  0x48   : > { %2829 = shalt.err (!%p2826_p7)
}
  0x49   : > { %s2830_s16 = scalar_lea.vmem %s191_s8, 128  ;;  %p2838_p1 = scmp.lt.s32.totalorder %s191_s8, %s191_s8 }
  0x4a   : > { %p2831_p9 = scmp.ne.s32.totalorder %s191_s8, %s2830_s16  ;;  %p2839_p2 = scmp.lt.s32.totalorder %s2830_s16, %s2830_s16 }
  0x4c   : > { %p2833_p12 = pnand %p2831_p9, %p3124_p13  ;;  %p2840_p4 = por %p2839_p2, %p2838_p1 }
  0x4e   : > { %p2834_p0 = pneg %p2833_p12 }
  0x50   : > { %p2841_p8 = pnand %p2840_p4, %p2834_p0 }
  0x52   : > { %2844 = shalt.err (!%p2841_p8)
}
  0x53   : > { %2650 = dma.hbm_to_vmem [thread:$0]  (!%p3108_p11), %s3588_s2, 128, %s191_s8, [#allocation6]  }
  0x54   : > { %s3016_s17 = smov [#allocation10]   ;;  %s2845_s10 = scalar_lea.hbm %s3590_s4, 2048 }
  0x55   : > { %s213_s30 = sshll.u32 %s3016_s17, 4  ;;  %p2846_p6 = scmp.ne.s32.totalorder %s3590_s4, %s2845_s10  ;;  %s214_s30 = int_to_ptr.vmem [resolvable:$true] %s213_s30 }
  0x56   : > { %p2852_p10 = scmp.lt.u32.totalorder %s2845_s10, %s3590_s4 }
  0x57   : > { %p2848_p4 = pnand %p2846_p6, %p3124_p13 }
  0x59   : > { %p2849_p8 = pneg %p2848_p4 }
  0x5b   : > { %p2854_p3 = pnand %p2852_p10, %p2849_p8 }
  0x5d   : > { %2857 = shalt.err (!%p2854_p3)
}
  0x5e   : > { %s2858_s8 = scalar_lea.vmem %s214_s30, 2048  ;;  %p2866_p12 = scmp.lt.s32.totalorder %s214_s30, %s214_s30 }
  0x5f   : > { %p2859_p5 = scmp.ne.s32.totalorder %s214_s30, %s2858_s8  ;;  %p2867_p0 = scmp.lt.s32.totalorder %s2858_s8, %s2858_s8 }
  0x61   : > { %p2861_p7 = pnand %p2859_p5, %p3124_p13  ;;  %p2868_p1 = por %p2867_p0, %p2866_p12 }
  0x63   : > { %p2862_p9 = pneg %p2861_p7 }
  0x65   : > { %p2869_p2 = pnand %p2868_p1, %p2862_p9 }
  0x67   : > { %2872 = shalt.err (!%p2869_p2)
}
  0x68   : > { %2656 = dma.hbm_to_vmem [thread:$0]  (!%p3108_p11), %s3590_s4, 2048, %s214_s30, [#allocation9], %s3014_s23, %s3014_s23, %s3015_s27  }
  0x69   : > { %s3215_s14 = sadd.s32 1, %s2993_s21   ;;  %s30_s29 = sadd.s32 1, %s2989_s20 }
  0x6a   : > { %s27_s28 = ssub.s32 %s2993_s21, %s3215_s14  ;;  %p37_p13 = scmp.ne.s32.totalorder %s2989_s20, %s2985_s19 }
  0x6b   : > { %p28_p6 = scmp.eq.s32.totalorder %s27_s28, 0  ;;  %p38_p4 = scmp.eq.s32.totalorder %s2993_s21, 0 }
  0x6c   : > { %p3600_p8 = scmp.eq.s32.totalorder %s3078_s22, 1  ;;  %p2669_p3 = scmp.lt.s32.totalorder %s2993_s21, 2 }
  0x6d   : > { %s3231_s7 = scalar_select %p28_p6, %s2989_s20, %s30_s29  }
  0x6e   : > { %p3225_p10 = por %p3600_p8, %p37_p13  ;;  %p39_p5 = por %p38_p4, %p37_p13 }
  0x6f   : > { %s227_s9 = sand.u32 1, %s2989_s20   ;;  %s1810_s30 = sshll.u32 %s2993_s21, 11 }
  0x70   : > { %s1785_s10 = sshll.u32 %s227_s9, 7  ;;  %s3238_s13 = scalar_lea.hbm %s3586_s0, %s1810_s30 }
  0x71   : > { %s231_s15 = scalar_lea.vmem [#allocation2], %s1785_s10  ;;  %p3242_p11 = pnand %p2669_p3, %p39_p5 }
  0x72   : > { %s238_s8 = sshll.u32 %s231_s15, 4  ;;  %s3246_s6 = scalar_lea.sflag [#allocation3], %s227_s9  ;;  %s3240_s8 = int_to_ptr.vmem [resolvable:$true] %s238_s8 }
  0x73   : > { %s2873_s29 = scalar_lea.hbm %s3238_s13, 2048  ;;  %p2875_p9 = pneg %p3242_p11 }
  0x74   : > { %p2874_p7 = scmp.ne.s32.totalorder %s3238_s13, %s2873_s29  ;;  %s2878_s30 = scalar_lea.hbm %s3586_s0, 4096 }
  0x75   : > { %p2879_p1 = scmp.lt.u32.totalorder %s3238_s13, %s3586_s0  ;;  %p2880_p2 = scmp.lt.u32.totalorder %s2878_s30, %s2873_s29 }
  0x76   : > { %p2876_p12 = pnand %p2875_p9, %p2874_p7  ;;  %p2882_p6 = scmp.lt.u32.totalorder %s2873_s29, %s3238_s13 }
  0x77   : > { %p2881_p13 = por %p2880_p2, %p2879_p1 }
  0x78   : > { %p2877_p0 = pneg %p2876_p12 }
  0x79   : > { %p2883_p4 = por %p2882_p6, %p2881_p13 }
  0x7b   : > { %p2884_p8 = pnand %p2883_p4, %p2877_p0 }
  0x7d   : > { %2887 = shalt.err (!%p2884_p8)
}
  0x7e   : > { %s2888_s9 = scalar_lea.vmem %s3240_s8, 2048  ;;  %s3017_s15 = smov [#allocation2]  }
  0x7f   : > { %p2889_p3 = scmp.ne.s32.totalorder %s3240_s8, %s2888_s9  ;;  %s2893_s28 = sshll.u32 %s3017_s15, 4  ;;  %s2894_s28 = int_to_ptr.vmem [resolvable:$false] %s2893_s28 }
  0x80   : > { %s2895_s10 = scalar_lea.vmem %s2894_s28, 4096  ;;  %p2896_p12 = scmp.lt.s32.totalorder %s3240_s8, %s2894_s28 }
  0x81   : > { %p2891_p5 = pnand %p2889_p3, %p2875_p9  ;;  %p2897_p1 = scmp.lt.s32.totalorder %s2895_s10, %s2888_s9 }
  0x83   : > { %p2892_p7 = pneg %p2891_p5  ;;  %p2898_p2 = por %p2897_p1, %p2896_p12 }
  0x85   : > { %p2899_p13 = pnand %p2898_p2, %p2892_p7 }
  0x87   : > { %2902 = shalt.err (!%p2899_p13)
}
  0x88   : > { %2660 = dma.hbm_to_vmem [thread:$0]  (!%p3242_p11), %s3238_s13, 2048, %s3240_s8, %s3246_s6, %s3014_s23, %s3014_s23, %s3015_s27  }
  0x89   : > { %p3603_p9 = scmp.ne.s32.totalorder %s3597_s26, 0 }
  0x8a   : > { %s3280_s29 = sand.u32 (!%p3603_p9), 1, %s2985_s19   ;;  %p3604_p0 = scmp.ne.s32.totalorder (!%p3603_p9), %s3595_s24, 0 }
  0x8b   : > { %250 = sbr.rel (%p3603_p9) target bundleno = 2085 (0x825), region = 40  ;;  %s1789_s30 = sshll.u32 (!%p3603_p9), %s3280_s29, 7 }
  0x8c   : > { %s253_s11 = scalar_lea.sflag (!%p3603_p9), [#allocation3], %s3280_s29  ;;  %s3284_s12 = scalar_lea.vmem (!%p3603_p9), [#allocation2], %s1789_s30 }
  0x92   : > { %2964 = dma.done.wait (%p3604_p0), %s253_s11, 2048  }
  0x93   : > { %2966 = vsyncadd (%p3604_p0), %s253_s11, 4294965248  ;;  %p3605_p11 = scmp.eq.s32.totalorder %s3078_s22, 0 }
  0x95   : > { %2968 = dma.done.wait (%p3605_p11), [#allocation6], 512   ;;  %p3606_p6 = pmov %p3605_p11 }
  0x97   : > { %2970 = vsyncadd (%p3606_p6), [#allocation6], 4294966784  ;;  %p3607_p4 = pmov %p3606_p6 }
  0x99   : > { %2972 = dma.done.wait (%p3607_p4), [#allocation9], 8192   ;;  %p3608_p8 = pmov %p3607_p4 }
  0x9a   : > { %v3298_v0 = vld [vmem:[#allocation5] sm:$0xff]  ;;  %v3300_v1 = vld [vmem:[#allocation5 + $0x8] sm:$0xff]  ;;  %v3302_v2 = vld [vmem:[#allocation5 + $0x10] sm:$0xff]  ;;  %s3307_s24 = scalar_lea.vmem [#allocation11], %s1789_s30  ;;  %s3312_s26 = smov 1  }
  0x9b   : > { %2974 = vsyncadd (%p3608_p8), [#allocation9], 4294959104  ;;  %v3304_v3 = vld [vmem:[#allocation7] sm:$0xff]  ;;  %v305_v4 = vld [vmem:[%s3284_s12] sm:$0xff]  }
  0x9c   : > { %306 = vst [vmem:[%s3307_s24] sm:$0xff] %v305_v4 }
  0x9d LB: >> { %vm314_vm0 = vcmask 64512   ;;  %v388_v5 = vld [vmem:[#allocation8] sm:$0xff]  ;;  %v389_v6 = vld [vmem:[#allocation8 + $0x8] sm:$0xff]  ;;  %v3018_v7 = vmov 0.0   ;;  %vm3019_vm1 = vmmov 0   ;;  %v3020_v9 = vmov 0.0|0.0   ;;  %s3001_s26 = sphi %s3312_s26, %s312_s26   ;;  %v2997_v4 = vphi %v305_v4, %v3609_v4  }
  0x9e   : >> { %1994 = vmatprep.subr.mxu0 %v3018_v7  ;;  %1996 = vmatprep.mubr.msk.f32.mxu0 %vm3019_vm1, %v3018_v7  ;;  %v2375_v8 = vpack.c.bf16 %v389_v6, %v388_v5  ;;  %v390_v10 = vld [vmem:[#allocation8 + $0x10] sm:$0xff]  ;;  %v391_v11 = vld [vmem:[#allocation8 + $0x18] sm:$0xff]  ;;  %v392_v13 = vld [vmem:[#allocation8 + $0x20] sm:$0xff]  ;;  %s1799_s23 = sshll.u32 %s3001_s26, 3  ;;  %s312_s26 = sadd.s32 1, %s3001_s26  }
  0x9f   : >> { %1995 = vmatpush3.msra.mxu0 %v2997_v4  ;;  %2374 = vmatprep.subr.bf16.mxu1 %v3020_v9  ;;  %v2378_v12 = vpack.c.bf16 %v391_v11, %v390_v10  ;;  %v393_v14 = vld [vmem:[#allocation8 + $0x28] sm:$0xff]  ;;  %v394_v16 = vld [vmem:[#allocation8 + $0x30] sm:$0xff]  ;;  %v395_v17 = vld [vmem:[#allocation8 + $0x38] sm:$0xff]  ;;  %s964_s27 = scalar_lea.vmem %s3284_s12, %s1799_s23 [#allocation2]  ;;  %s967_s13 = scalar_lea.vmem %s3307_s24, %s1799_s23 [#allocation11] }
  0xa0   : >> { %1997 = vmatmul.mubr.msk.f32.vlgmr.msra.gmra.mrb[0].mxu0 %vm314_vm0, %v3298_v0  ;;  %2034 = vmatprep.subr.mxu0 %v3018_v7  ;;  %v2381_v15 = vpack.c.bf16 %v393_v14, %v392_v13  ;;  %v2384_v18 = vpack.c.bf16 %v395_v17, %v394_v16  ;;  %v396_v19 = vld [vmem:[#allocation8 + $0x40] sm:$0xff]  ;;  %v397_v20 = vld [vmem:[#allocation8 + $0x48] sm:$0xff]  ;;  %v398_v22 = vld [vmem:[#allocation8 + $0x50] sm:$0xff]  ;;  %p309_p3 = scmp.ge.s32.totalorder %s312_s26, 16  }
  0xa1   : >> { %2035 = vmatpush3.msra.mxu0 %v2997_v4  ;;  %2036 = vmatprep.mubr.msk.f32.mxu0 %vm3019_vm1, %v3018_v7  ;;  %v2387_v21 = vpack.c.bf16 %v397_v20, %v396_v19  ;;  %v399_v23 = vld [vmem:[#allocation8 + $0x58] sm:$0xff]  ;;  %v400_v25 = vld [vmem:[#allocation8 + $0x60] sm:$0xff]  ;;  %v401_v26 = vld [vmem:[#allocation8 + $0x68] sm:$0xff]  ;;  %s3425_s8 = smov (%p309_p3), 0  }
  0xa2   : >> { %2074 = vmatprep.subr.mxu0 %v3018_v7  ;;  %2376 = vmatpush3.bf16.msra.mxu1 %v2375_v8  ;;  %v2390_v24 = vpack.c.bf16 %v399_v23, %v398_v22  ;;  %v2393_v27 = vpack.c.bf16 %v401_v26, %v400_v25  ;;  %v402_v28 = vld [vmem:[#allocation8 + $0x70] sm:$0xff]  ;;  %v403_v29 = vld [vmem:[#allocation8 + $0x78] sm:$0xff]  ;;  %v797_v31 = vld [vmem:[#allocation10] sm:$0xff] }
  0xa3   : >> { %2377 = vmatprep.subr.bf16.mxu1 %v3020_v9  ;;  %2031 = vmatprep.mubr.msk.f32.mxu1 %vm3019_vm1, %v3018_v7  ;;  %v2396_v30 = vpack.c.bf16 %v403_v29, %v402_v28  ;;  %v798_v32 = vld [vmem:[#allocation10 + $0x8] sm:$0xff]  ;;  %v799_v33 = vld [vmem:[#allocation10 + $0x10] sm:$0xff]  ;;  %v800_v35 = vld [vmem:[#allocation10 + $0x18] sm:$0xff] }
  0xa4   : >> { %2037 = vmatmul.mubr.msk.f32.vlgmr.msra.gmra.mrb[2].mxu0 %vm314_vm0, %v3300_v1  ;;  %v3347_v34 = vpack.c.bf16 %v798_v32, %v797_v31  ;;  %v3350_v36 = vpack.c.bf16 %v800_v35, %v799_v33  ;;  %v801_v37 = vld [vmem:[#allocation10 + $0x20] sm:$0xff]  ;;  %v802_v38 = vld [vmem:[#allocation10 + $0x28] sm:$0xff]  ;;  %v803_v40 = vld [vmem:[#allocation10 + $0x30] sm:$0xff] }
  0xa5   : >> { %2075 = vmatpush3.msra.mxu0 %v2997_v4  ;;  %2076 = vmatprep.mubr.msk.f32.mxu0 %vm3019_vm1, %v3018_v7  ;;  %v3354_v39 = vpack.c.bf16 %v802_v38, %v801_v37  ;;  %v804_v41 = vld [vmem:[#allocation10 + $0x38] sm:$0xff]  ;;  %v805_v43 = vld [vmem:[#allocation10 + $0x40] sm:$0xff]  ;;  %v806_v44 = vld [vmem:[#allocation10 + $0x48] sm:$0xff] }
  0xa6   : >> { %2379 = vmatpush3.bf16.msra.mxu1 %v2378_v12  ;;  %2446 = vmatprep.subr.bf16.mxu0 %v3020_v9  ;;  %v3358_v42 = vpack.c.bf16 %v804_v41, %v803_v40  ;;  %v3362_v45 = vpack.c.bf16 %v806_v44, %v805_v43  ;;  %v807_v46 = vld [vmem:[#allocation10 + $0x50] sm:$0xff]  ;;  %v808_v47 = vld [vmem:[#allocation10 + $0x58] sm:$0xff]  ;;  %v809_v49 = vld [vmem:[#allocation10 + $0x60] sm:$0xff] }
  0xa7   : >> { %2380 = vmatprep.subr.bf16.mxu1 %v3020_v9  ;;  %v3366_v48 = vpack.c.bf16 %v808_v47, %v807_v46  ;;  %v810_v50 = vld [vmem:[#allocation10 + $0x68] sm:$0xff]  ;;  %v549_v52 = vld [vmem:[#allocation8 + $0x80] sm:$0xff]  ;;  %v551_v55 = vld [vmem:[#allocation8 + $0x90] sm:$0xff] }
  0xa8   : >> { %2077 = vmatmul.mubr.msk.f32.vlgmr.msra.gmra.mrb[4].mxu0 %vm314_vm0, %v3302_v2  ;;  %v3370_v51 = vpack.c.bf16 %v810_v50, %v809_v49  ;;  %v550_v53 = vld [vmem:[#allocation8 + $0x88] sm:$0xff]  ;;  %v552_v56 = vld [vmem:[#allocation8 + $0x98] sm:$0xff]  ;;  %v553_v60 = vld [vmem:[#allocation8 + $0xa0] sm:$0xff] }
  0xa9   : >> { %2146 = vmatprep.mubr.msk.f32.mxu0 %vm3019_vm1, %v3018_v7  ;;  %2448 = vmatpush3.bf16.msra.mxu0 %v3347_v34  ;;  %v2399_v54 = vpack.c.bf16 %v550_v53, %v549_v52  ;;  %v2402_v59 = vpack.c.bf16 %v552_v56, %v551_v55  ;;  %v554_v61 = vld [vmem:[#allocation8 + $0xa8] sm:$0xff]  ;;  %v555_v5 = vld [vmem:[#allocation8 + $0xb0] sm:$0xff]  ;;  %v556_v6 = vld [vmem:[#allocation8 + $0xb8] sm:$0xff] }
  0xaa   : >> { %2382 = vmatpush3.bf16.msra.mxu1 %v2381_v15  ;;  %2449 = vmatprep.subr.bf16.mxu0 %v3020_v9  ;;  %v2405_v4 = vpack.c.bf16 %v554_v61, %v553_v60  ;;  %v2408_v11 = vpack.c.bf16 %v556_v6, %v555_v5  ;;  %v557_v12 = vld [vmem:[#allocation8 + $0xc0] sm:$0xff]  ;;  %v558_v13 = vld [vmem:[#allocation8 + $0xc8] sm:$0xff]  ;;  %v559_v15 = vld [vmem:[#allocation8 + $0xd0] sm:$0xff] }
  0xab   : >> { %2383 = vmatprep.subr.bf16.mxu1 %v3020_v9  ;;  %v2411_v14 = vpack.c.bf16 %v558_v13, %v557_v12  ;;  %v560_v16 = vld [vmem:[#allocation8 + $0xd8] sm:$0xff]  ;;  %v562_v19 = vld [vmem:[#allocation8 + $0xe8] sm:$0xff]  ;;  %v716_v33 = vld [vmem:[#allocation8 + $0x130] sm:$0xff] }
  0xac   : >> { %v2414_v17 = vpack.c.bf16 %v560_v16, %v559_v15  ;;  %v564_v22 = vld [vmem:[#allocation8 + $0xf8] sm:$0xff]  ;;  %v711_v25 = vld [vmem:[#allocation8 + $0x108] sm:$0xff]  ;;  %v718_v38 = vld [vmem:[#allocation8 + $0x140] sm:$0xff] }
  0xad   : >> { %2451 = vmatpush3.bf16.msra.mxu0 %v3350_v36  ;;  %v713_v28 = vld [vmem:[#allocation8 + $0x118] sm:$0xff]  ;;  %v715_v31 = vld [vmem:[#allocation8 + $0x128] sm:$0xff]  ;;  %v720_v43 = vld [vmem:[#allocation8 + $0x150] sm:$0xff] }
  0xae   : >> { %2385 = vmatpush3.bf16.msra.mxu1 %v2384_v18  ;;  %2452 = vmatprep.subr.bf16.mxu0 %v3020_v9  ;;  %v561_v18 = vld [vmem:[#allocation8 + $0xe0] sm:$0xff]  ;;  %v717_v35 = vld [vmem:[#allocation8 + $0x138] sm:$0xff]  ;;  %v719_v40 = vld [vmem:[#allocation8 + $0x148] sm:$0xff] }
  0xaf   : >> { %2386 = vmatprep.subr.bf16.mxu1 %v3020_v9  ;;  %v2417_v20 = vpack.c.bf16 %v562_v19, %v561_v18  ;;  %v2432_v37 = vpack.c.bf16 %v717_v35, %v716_v33  ;;  %v2435_v41 = vpack.c.bf16 %v719_v40, %v718_v38  ;;  %v721_v44 = vld [vmem:[#allocation8 + $0x158] sm:$0xff]  ;;  %v722_v47 = vld [vmem:[#allocation8 + $0x160] sm:$0xff]  ;;  %v723_v49 = vld [vmem:[#allocation8 + $0x168] sm:$0xff] }
  0xb0   : >> { %v2438_v46 = vpack.c.bf16 %v721_v44, %v720_v43  ;;  %v2441_v50 = vpack.c.bf16 %v723_v49, %v722_v47  ;;  %v724_v52 = vld [vmem:[#allocation8 + $0x170] sm:$0xff]  ;;  %v725_v53 = vld [vmem:[#allocation8 + $0x178] sm:$0xff]  ;;  %v965_v5 = vld [vmem:[%s964_s27] sm:$0xff] }
  0xb1   : >> { %2454 = vmatpush3.bf16.msra.mxu0 %v3354_v39  ;;  %v811_v55 = vld [vmem:[#allocation10 + $0x70] sm:$0xff]  ;;  %v812_v56 = vld [vmem:[#allocation10 + $0x78] sm:$0xff] }
  0xb2   : >> { %2388 = vmatpush3.bf16.msra.mxu1 %v2387_v21  ;;  %2455 = vmatprep.subr.bf16.mxu0 %v3020_v9  ;;  %v563_v21 = vld [vmem:[#allocation8 + $0xf0] sm:$0xff] }
  0xb3   : >> { %2389 = vmatprep.subr.bf16.mxu1 %v3020_v9  ;;  %v2420_v23 = vpack.c.bf16 %v564_v22, %v563_v21 }
  0xb5   : >> { %2457 = vmatpush3.bf16.msra.mxu0 %v3358_v42 }
  0xb6   : >> { %2391 = vmatpush3.bf16.msra.mxu1 %v2390_v24  ;;  %2458 = vmatprep.subr.bf16.mxu0 %v3020_v9  ;;  %v710_v24 = vld [vmem:[#allocation8 + $0x100] sm:$0xff] }
  0xb7   : >> { %2392 = vmatprep.subr.bf16.mxu1 %v3020_v9  ;;  %v2423_v26 = vpack.c.bf16 %v711_v25, %v710_v24 }
  0xb9   : >> { %2460 = vmatpush3.bf16.msra.mxu0 %v3362_v45 }
  0xba   : >> { %2394 = vmatpush3.bf16.msra.mxu1 %v2393_v27  ;;  %2461 = vmatprep.subr.bf16.mxu0 %v3020_v9  ;;  %v712_v27 = vld [vmem:[#allocation8 + $0x110] sm:$0xff] }
  0xbb   : >> { %2395 = vmatprep.subr.bf16.mxu1 %v3020_v9  ;;  %v2426_v29 = vpack.c.bf16 %v713_v28, %v712_v27 }
  0xbd   : >> { %2463 = vmatpush3.bf16.msra.mxu0 %v3366_v48 }
  0xbe   : >> { %2397 = vmatpush3.bf16.msra.mxu1 %v2396_v30  ;;  %2464 = vmatprep.subr.bf16.mxu0 %v3020_v9  ;;  %v714_v30 = vld [vmem:[#allocation8 + $0x120] sm:$0xff] }
  0xbf   : >> { %2398 = vmatprep.subr.bf16.mxu1 %v3020_v9  ;;  %v2429_v32 = vpack.c.bf16 %v715_v31, %v714_v30 }
  0xc1   : >> { %2466 = vmatpush3.bf16.msra.mxu0 %v3370_v51 }
  0xc2   : >> { %2467 = vmatprep.subr.bf16.mxu0 %v3020_v9 }
 0x173   : >> { %v384_v57 = vpop.f32.mrb[0].mxu0 }
 0x174   : >> { %v1998_v58 = vpop.f32.mrb[1].mxu0  ;;  %2032 = vmatmul.mubr.f32.vlgmr.msra.gmra.mrb[0].mxu1 %v384_v57  ;;  %v2468_v57 = vpack.c.bf16 %v812_v56, %v811_v55 }
 0x175   : >> { %2400 = vmatpush3.bf16.msra.mxu1 %v2399_v54  ;;  %2071 = vmatprep.mubr.msk.f32.mxu1 %vm3019_vm1, %v3018_v7  ;;  %v2444_v54 = vpack.c.bf16 %v725_v53, %v724_v52 }
 0x176   : >> { %2401 = vmatprep.subr.bf16.mxu1 %v3020_v9  ;;  %2469 = vmatpush3.bf16.msra.mxu0 %v2468_v57 }
 0x177   : >> { %v544_v62 = vpop.f32.mrb[2].mxu0  ;;  %2470 = vmatprep.subr.bf16.mxu0 %v3020_v9 }
 0x178   : >> { %v2038_v63 = vpop.f32.mrb[3].mxu0 }
 0x179   : >> { %2403 = vmatpush3.bf16.msra.mxu1 %v2402_v59 }
 0x17a   : >> { %2404 = vmatprep.subr.bf16.mxu1 %v3020_v9 }
 0x17b   : >> { %v3379_v8 = vpop.f32.mrb[4].mxu0 }
 0x17c   : >> { %v2078_v10 = vpop.f32.mrb[5].mxu0 }
 0x17d   : >> { %2406 = vmatpush3.bf16.msra.mxu1 %v2405_v4 }
 0x17e   : >> { %2407 = vmatprep.subr.bf16.mxu1 %v3020_v9 }
 0x181   : >> { %2409 = vmatpush3.bf16.msra.mxu1 %v2408_v11 }
 0x182   : >> { %2410 = vmatprep.subr.bf16.mxu1 %v3020_v9 }
 0x185   : >> { %2412 = vmatpush3.bf16.msra.mxu1 %v2411_v14 }
 0x186   : >> { %2413 = vmatprep.subr.bf16.mxu1 %v3020_v9 }
 0x189   : >> { %2415 = vmatpush3.bf16.msra.mxu1 %v2414_v17 }
 0x18a   : >> { %2416 = vmatprep.subr.bf16.mxu1 %v3020_v9 }
 0x18d   : >> { %2418 = vmatpush3.bf16.msra.mxu1 %v2417_v20 }
 0x18e   : >> { %2419 = vmatprep.subr.bf16.mxu1 %v3020_v9 }
 0x191   : >> { %2421 = vmatpush3.bf16.msra.mxu1 %v2420_v23 }
 0x192   : >> { %2422 = vmatprep.subr.bf16.mxu1 %v3020_v9 }
 0x194   : >> { %2072 = vmatmul.mubr.f32.vlgmr.msra.gmra.mrb[0].mxu1 %v544_v62 }
 0x195   : >> { %2424 = vmatpush3.bf16.msra.mxu1 %v2423_v26  ;;  %2111 = vmatprep.mubr.msk.f32.mxu1 %vm3019_vm1, %v3018_v7 }
 0x196   : >> { %2425 = vmatprep.subr.bf16.mxu1 %v3020_v9 }
 0x199   : >> { %2427 = vmatpush3.bf16.msra.mxu1 %v2426_v29 }
 0x19a   : >> { %2428 = vmatprep.subr.bf16.mxu1 %v3020_v9 }
 0x19d   : >> { %2430 = vmatpush3.bf16.msra.mxu1 %v2429_v32 }
 0x19e   : >> { %2431 = vmatprep.subr.bf16.mxu1 %v3020_v9 }
 0x1a1   : >> { %2433 = vmatpush3.bf16.msra.mxu1 %v2432_v37 }
 0x1a2   : >> { %2434 = vmatprep.subr.bf16.mxu1 %v3020_v9 }
 0x1a5   : >> { %2436 = vmatpush3.bf16.msra.mxu1 %v2435_v41 }
 0x1a6   : >> { %2437 = vmatprep.subr.bf16.mxu1 %v3020_v9 }
 0x1a9   : >> { %2439 = vmatpush3.bf16.msra.mxu1 %v2438_v46 }
 0x1aa   : >> { %2440 = vmatprep.subr.bf16.mxu1 %v3020_v9 }
 0x1ad   : >> { %2442 = vmatpush3.bf16.msra.mxu1 %v2441_v50 }
 0x1ae   : >> { %2443 = vmatprep.subr.bf16.mxu1 %v3020_v9 }
 0x1b1   : >> { %2445 = vmatpush3.bf16.msra.mxu1 %v2444_v54 }
 0x1b4   : >> { %2112 = vmatmul.mubr.f32.vlgmr.msra.gmra.mrb[0].mxu1 %v3379_v8 }
 0x287   : >> { %v792_v58 = vpop.f32.mrb[0].mxu1 }
 0x288   : >> { %v2614_v59 = vadd.f32 %v792_v58, %v3304_v3  ;;  %v2113_v60 = vpop.f32.mrb[1].mxu1 }
 0x28a   : >> { %2147 = vmatmul.mubr.f32.vlgmr.msra.gmra.mrb[6].mxu0 %v2614_v59 }
 0x28b   : >> { %2472 = vmatpush3.bf16.msra.mxu0 %v3347_v34  ;;  %2181 = vmatprep.mubr.msk.f32.mxu0 %vm3019_vm1, %v3018_v7 }
 0x28c   : >> { %2473 = vmatprep.subr.bf16.mxu0 %v3020_v9 }
 0x28f   : >> { %2475 = vmatpush3.bf16.msra.mxu0 %v3350_v36 }
 0x290   : >> { %2476 = vmatprep.subr.bf16.mxu0 %v3020_v9 }
 0x293   : >> { %2478 = vmatpush3.bf16.msra.mxu0 %v3354_v39 }
 0x294   : >> { %2479 = vmatprep.subr.bf16.mxu0 %v3020_v9 }
 0x297   : >> { %2481 = vmatpush3.bf16.msra.mxu0 %v3358_v42 }
 0x298   : >> { %2482 = vmatprep.subr.bf16.mxu0 %v3020_v9 }
 0x29b   : >> { %2484 = vmatpush3.bf16.msra.mxu0 %v3362_v45 }
 0x29c   : >> { %2485 = vmatprep.subr.bf16.mxu0 %v3020_v9 }
 0x29f   : >> { %2487 = vmatpush3.bf16.msra.mxu0 %v3366_v48 }
 0x2a0   : >> { %2488 = vmatprep.subr.bf16.mxu0 %v3020_v9 }
 0x2a3   : >> { %2490 = vmatpush3.bf16.msra.mxu0 %v3370_v51 }
 0x2a4   : >> { %2491 = vmatprep.subr.bf16.mxu0 %v3020_v9 }
 0x2a7   : >> { %2493 = vmatpush3.bf16.msra.mxu0 %v2468_v57 }
 0x35d   : >> { %v879_v7 = vpop.f32.mrb[6].mxu0 }
 0x35e   : >> { %v883_v34 = vsub.f32 %v2614_v59, %v879_v7  ;;  %v2148_v36 = vpop.f32.mrb[7].mxu0 }
 0x360   : >> { %v884_v39 = vmul.f32 %v883_v34, %v883_v34 }
 0x362   : >> { %2182 = vmatmul.mubr.f32.vlgmr.msra.gmra.mrb[8].mxu0 %v884_v39 }
 0x435   : >> { %v951_v42 = vpop.f32.mrb[8].mxu0 }
 0x436   : >> { %v952_v45 = vadd.f32 1e-05, %v951_v42  ;;  %v2183_v61 = vpop.f32.mrb[9].mxu0 }
 0x438   : >> { %2753 = vrsqrt.f32 %v952_v45 }
 0x442   : >> { %v2754_v48 = vpop.eup %2753 }
 0x443   : >> { %v956_v62 = vmul.f32 %v2754_v48, %v883_v34 }
 0x445   : >> { %v958_v63 = vmin.f32 %v956_v62, 0.0  ;;  %vm957_vm2 = vcmp.gt.f32.partialorder %v956_v62, 0.0 }
 0x447   : >> { %v959_v4 = vmul.f32 1.442695, %v958_v63 }
 0x449   : >> { %2755 = vpow2.f32 %v959_v4 }
 0x453   : >> { %v2756_v9 = vpop.eup %2755  ;;  %311 = sbr.rel (!%p309_p3) target bundleno = 157 (0x9d), region = 124 }
 0x454   : >> { %v1798_v51 = vadd.f32 -1.0, %v2756_v9 }
 0x456   : >> { %v962_v6 = vsel %vm957_vm2, %v956_v62, %v1798_v51 }
 0x457   : >> { %v966_v8 = vadd.f32 %v965_v5, %v962_v6  }
 0x459   : >> { %968 = vst [vmem:[%s967_s13] sm:$0xff] %v966_v8  ;;  %v3609_v4 = vmov %v966_v8 }
 0x45a LB: >> { %v1051_v10 = vld [vmem:[#allocation8] sm:$0xff]  ;;  %v1052_v11 = vld [vmem:[#allocation8 + $0x8] sm:$0xff]  ;;  %v3021_v12 = vmov 0.0   ;;  %vm3022_vm3 = vmmov 0   ;;  %v3023_v14 = vmov 0.0|0.0   ;;  %v1053_v15 = vld [vmem:[#allocation8 + $0x10] sm:$0xff]  ;;  %s3009_s8 = sphi %s3425_s8, %s974_s8   ;;  %v3005_v8 = vphi %v966_v8, %v1629_v8  }
 0x45b   : >> { %2184 = vmatprep.subr.mxu0 %v3021_v12  ;;  %2186 = vmatprep.mubr.msk.f32.mxu0 %vm3022_vm3, %v3021_v12  ;;  %v2495_v13 = vpack.c.bf16 %v1052_v11, %v1051_v10  ;;  %v1054_v16 = vld [vmem:[#allocation8 + $0x18] sm:$0xff]  ;;  %v1055_v18 = vld [vmem:[#allocation8 + $0x20] sm:$0xff]  ;;  %v1056_v19 = vld [vmem:[#allocation8 + $0x28] sm:$0xff]  ;;  %s976_s16 = ssub.s32 14, %s3009_s8  ;;  %s974_s8 = sadd.s32 1, %s3009_s8  }
 0x45c   : >> { %2185 = vmatpush3.msra.mxu0 %v3005_v8  ;;  %2494 = vmatprep.subr.bf16.mxu1 %v3023_v14  ;;  %v2498_v17 = vpack.c.bf16 %v1054_v16, %v1053_v15  ;;  %v2501_v20 = vpack.c.bf16 %v1056_v19, %v1055_v18  ;;  %v1057_v21 = vld [vmem:[#allocation8 + $0x30] sm:$0xff]  ;;  %v1058_v22 = vld [vmem:[#allocation8 + $0x38] sm:$0xff]  ;;  %v1059_v24 = vld [vmem:[#allocation8 + $0x40] sm:$0xff]  ;;  %s1804_s6 = sshll.u32 %s976_s16, 3  ;;  %p971_p5 = scmp.ge.s32.totalorder %s974_s8, 15  }
 0x45d   : >> { %2187 = vmatmul.mubr.msk.f32.vlgmr.msra.gmra.mrb[0].mxu0 %vm314_vm0, %v3298_v0  ;;  %2224 = vmatprep.subr.mxu0 %v3021_v12  ;;  %v2504_v23 = vpack.c.bf16 %v1058_v22, %v1057_v21  ;;  %v1060_v25 = vld [vmem:[#allocation8 + $0x48] sm:$0xff]  ;;  %v1061_v27 = vld [vmem:[#allocation8 + $0x50] sm:$0xff]  ;;  %v1062_v28 = vld [vmem:[#allocation8 + $0x58] sm:$0xff]  ;;  %s1627_s9 = scalar_lea.vmem %s3307_s24, %s1804_s6 [#allocation11]  ;;  %s1811_s15 = sshll.u32 (%p971_p5), %s3078_s22, 11 }
 0x45e   : >> { %2225 = vmatpush3.msra.mxu0 %v3005_v8  ;;  %2226 = vmatprep.mubr.msk.f32.mxu0 %vm3022_vm3, %v3021_v12  ;;  %v2507_v26 = vpack.c.bf16 %v1060_v25, %v1059_v24  ;;  %v2510_v29 = vpack.c.bf16 %v1062_v28, %v1061_v27  ;;  %v1063_v30 = vld [vmem:[#allocation8 + $0x60] sm:$0xff]  ;;  %v1064_v31 = vld [vmem:[#allocation8 + $0x68] sm:$0xff]  ;;  %v1065_v33 = vld [vmem:[#allocation8 + $0x70] sm:$0xff]  ;;  %s3539_s30 = scalar_lea.hbm (%p971_p5), %s3591_s5, %s1811_s15  ;;  %s1645_s11 = sshll.u32 (%p971_p5), %s3307_s24, 4  ;;  %s3542_s11 = int_to_ptr.vmem [resolvable:$true] %s1645_s11 }
 0x45f   : >> { %2264 = vmatprep.subr.mxu0 %v3021_v12  ;;  %2496 = vmatpush3.bf16.msra.mxu1 %v2495_v13  ;;  %v2513_v32 = vpack.c.bf16 %v1064_v31, %v1063_v30  ;;  %v1066_v35 = vld [vmem:[#allocation8 + $0x78] sm:$0xff]  ;;  %v1460_v38 = vld [vmem:[#allocation10] sm:$0xff]  ;;  %v1461_v40 = vld [vmem:[#allocation10 + $0x8] sm:$0xff]  ;;  %s1632_s12 = scalar_lea.sflag (%p971_p5), [#allocation4], %s3280_s29  ;;  %s2903_s26 = scalar_lea.vmem (%p971_p5), %s3542_s11, 2048 }
 0x460   : >> { %2497 = vmatprep.subr.bf16.mxu1 %v3023_v14  ;;  %2221 = vmatprep.mubr.msk.f32.mxu1 %vm3022_vm3, %v3021_v12  ;;  %v2516_v37 = vpack.c.bf16 %v1066_v35, %v1065_v33  ;;  %v1462_v41 = vld [vmem:[#allocation10 + $0x10] sm:$0xff]  ;;  %v3460_v43 = vpack.c.bf16 %v1461_v40, %v1460_v38  ;;  %v1463_v44 = vld [vmem:[#allocation10 + $0x18] sm:$0xff]  ;;  %v1464_v47 = vld [vmem:[#allocation10 + $0x20] sm:$0xff]  ;;  %p2904_p7 = scmp.ne.s32.totalorder (%p971_p5), %s3542_s11, %s2903_s26  ;;  %s3024_s23 = smov (%p971_p5), [#allocation11]  }
 0x461   : >> { %2227 = vmatmul.mubr.msk.f32.vlgmr.msra.gmra.mrb[2].mxu0 %vm314_vm0, %v3300_v1  ;;  %v3463_v46 = vpack.c.bf16 %v1463_v44, %v1462_v41  ;;  %v1465_v49 = vld [vmem:[#allocation10 + $0x28] sm:$0xff]  ;;  %v1466_v52 = vld [vmem:[#allocation10 + $0x30] sm:$0xff]  ;;  %v1467_v53 = vld [vmem:[#allocation10 + $0x38] sm:$0xff]  ;;  %s2907_s27 = sshll.u32 (%p971_p5), %s3024_s23, 4  ;;  %s2908_s27 = int_to_ptr.vmem [resolvable:$false] %s2907_s27 }
 0x462   : >> { %2265 = vmatpush3.msra.mxu0 %v3005_v8  ;;  %2266 = vmatprep.mubr.msk.f32.mxu0 %vm3022_vm3, %v3021_v12  ;;  %v3467_v50 = vpack.c.bf16 %v1465_v49, %v1464_v47  ;;  %v3471_v54 = vpack.c.bf16 %v1467_v53, %v1466_v52  ;;  %v1468_v55 = vld [vmem:[#allocation10 + $0x40] sm:$0xff]  ;;  %v1469_v56 = vld [vmem:[#allocation10 + $0x48] sm:$0xff]  ;;  %v1470_v58 = vld [vmem:[#allocation10 + $0x50] sm:$0xff]  ;;  %p2905_p12 = pnand (%p971_p5), %p2904_p7, %p3225_p10  ;;  %s2909_s22 = scalar_lea.vmem (%p971_p5), %s2908_s27, 4096 }
 0x463   : >> { %2499 = vmatpush3.bf16.msra.mxu1 %v2498_v17  ;;  %2566 = vmatprep.subr.bf16.mxu0 %v3023_v14  ;;  %v3475_v57 = vpack.c.bf16 %v1469_v56, %v1468_v55  ;;  %v1471_v59 = vld [vmem:[#allocation10 + $0x58] sm:$0xff]  ;;  %v1472_v7 = vld [vmem:[#allocation10 + $0x60] sm:$0xff]  ;;  %v1473_v34 = vld [vmem:[#allocation10 + $0x68] sm:$0xff]  ;;  %p2910_p2 = scmp.lt.s32.totalorder (%p971_p5), %s3542_s11, %s2908_s27  ;;  %p2911_p13 = scmp.lt.s32.totalorder (%p971_p5), %s2909_s22, %s2903_s26 }
 0x464   : >> { %2500 = vmatprep.subr.bf16.mxu1 %v3023_v14  ;;  %v3479_v60 = vpack.c.bf16 %v1471_v59, %v1470_v58  ;;  %v3483_v36 = vpack.c.bf16 %v1473_v34, %v1472_v7  ;;  %v1212_v39 = vld [vmem:[#allocation8 + $0x80] sm:$0xff]  ;;  %v1213_v42 = vld [vmem:[#allocation8 + $0x88] sm:$0xff]  ;;  %v1214_v61 = vld [vmem:[#allocation8 + $0x90] sm:$0xff]  ;;  %p2906_p1 = pneg (%p971_p5), %p2905_p12 }
 0x465   : >> { %2267 = vmatmul.mubr.msk.f32.vlgmr.msra.gmra.mrb[4].mxu0 %vm314_vm0, %v3302_v2  ;;  %v2519_v45 = vpack.c.bf16 %v1213_v42, %v1212_v39  ;;  %v1215_v48 = vld [vmem:[#allocation8 + $0x98] sm:$0xff]  ;;  %v1216_v9 = vld [vmem:[#allocation8 + $0xa0] sm:$0xff]  ;;  %v1217_v51 = vld [vmem:[#allocation8 + $0xa8] sm:$0xff]  ;;  %p2912_p9 = por (%p971_p5), %p2911_p13, %p2910_p2 }
 0x466   : >> { %2336 = vmatprep.mubr.msk.f32.mxu0 %vm3022_vm3, %v3021_v12  ;;  %2568 = vmatpush3.bf16.msra.mxu0 %v3460_v43  ;;  %v2522_v4 = vpack.c.bf16 %v1215_v48, %v1214_v61  ;;  %v2525_v8 = vpack.c.bf16 %v1217_v51, %v1216_v9  ;;  %v1218_v10 = vld [vmem:[#allocation8 + $0xb0] sm:$0xff]  ;;  %v1219_v11 = vld [vmem:[#allocation8 + $0xb8] sm:$0xff]  ;;  %v1220_v17 = vld [vmem:[#allocation8 + $0xc0] sm:$0xff] }
 0x467   : >> { %2502 = vmatpush3.bf16.msra.mxu1 %v2501_v20  ;;  %2569 = vmatprep.subr.bf16.mxu0 %v3023_v14  ;;  %v2528_v16 = vpack.c.bf16 %v1219_v11, %v1218_v10  ;;  %v1221_v18 = vld [vmem:[#allocation8 + $0xc8] sm:$0xff]  ;;  %v1222_v20 = vld [vmem:[#allocation8 + $0xd0] sm:$0xff]  ;;  %v1223_v21 = vld [vmem:[#allocation8 + $0xd8] sm:$0xff]  ;;  %p2913_p0 = pnand (%p971_p5), %p2912_p9, %p2906_p1 }
 0x468   : >> { %2503 = vmatprep.subr.bf16.mxu1 %v3023_v14  ;;  %v2531_v19 = vpack.c.bf16 %v1221_v18, %v1220_v17  ;;  %v2534_v22 = vpack.c.bf16 %v1223_v21, %v1222_v20  ;;  %v1225_v24 = vld [vmem:[#allocation8 + $0xe8] sm:$0xff]  ;;  %v1227_v27 = vld [vmem:[#allocation8 + $0xf8] sm:$0xff]  ;;  %v1379_v41 = vld [vmem:[#allocation8 + $0x130] sm:$0xff] }
 0x469   : >> { %v1374_v30 = vld [vmem:[#allocation8 + $0x108] sm:$0xff]  ;;  %v1376_v33 = vld [vmem:[#allocation8 + $0x118] sm:$0xff]  ;;  %v1381_v49 = vld [vmem:[#allocation8 + $0x140] sm:$0xff] }
 0x46a   : >> { %2571 = vmatpush3.bf16.msra.mxu0 %v3463_v46  ;;  %v1378_v38 = vld [vmem:[#allocation8 + $0x128] sm:$0xff]  ;;  %v1380_v44 = vld [vmem:[#allocation8 + $0x138] sm:$0xff]  ;;  %v1383_v55 = vld [vmem:[#allocation8 + $0x150] sm:$0xff] }
 0x46b   : >> { %2505 = vmatpush3.bf16.msra.mxu1 %v2504_v23  ;;  %2572 = vmatprep.subr.bf16.mxu0 %v3023_v14  ;;  %v1224_v23 = vld [vmem:[#allocation8 + $0xe0] sm:$0xff]  ;;  %v2552_v47 = vpack.c.bf16 %v1380_v44, %v1379_v41  ;;  %v1382_v52 = vld [vmem:[#allocation8 + $0x148] sm:$0xff]  ;;  %v1384_v56 = vld [vmem:[#allocation8 + $0x158] sm:$0xff] }
 0x46c   : >> { %2506 = vmatprep.subr.bf16.mxu1 %v3023_v14  ;;  %v2537_v25 = vpack.c.bf16 %v1225_v24, %v1224_v23  ;;  %v2555_v53 = vpack.c.bf16 %v1382_v52, %v1381_v49  ;;  %v2558_v58 = vpack.c.bf16 %v1384_v56, %v1383_v55  ;;  %v1385_v59 = vld [vmem:[#allocation8 + $0x160] sm:$0xff]  ;;  %v1386_v7 = vld [vmem:[#allocation8 + $0x168] sm:$0xff]  ;;  %v1387_v39 = vld [vmem:[#allocation8 + $0x170] sm:$0xff] }
 0x46d   : >> { %v2561_v34 = vpack.c.bf16 %v1386_v7, %v1385_v59  ;;  %v1388_v42 = vld [vmem:[#allocation8 + $0x178] sm:$0xff]  ;;  %v1474_v61 = vld [vmem:[#allocation10 + $0x70] sm:$0xff]  ;;  %v1628_v10 = vld [vmem:[%s1627_s9] sm:$0xff] }
 0x46e   : >> { %2574 = vmatpush3.bf16.msra.mxu0 %v3467_v50  ;;  %v1475_v48 = vld [vmem:[#allocation10 + $0x78] sm:$0xff] }
 0x46f   : >> { %2508 = vmatpush3.bf16.msra.mxu1 %v2507_v26  ;;  %2575 = vmatprep.subr.bf16.mxu0 %v3023_v14  ;;  %v1226_v26 = vld [vmem:[#allocation8 + $0xf0] sm:$0xff] }
 0x470   : >> { %2509 = vmatprep.subr.bf16.mxu1 %v3023_v14  ;;  %v2540_v28 = vpack.c.bf16 %v1227_v27, %v1226_v26 }
 0x472   : >> { %2577 = vmatpush3.bf16.msra.mxu0 %v3471_v54 }
 0x473   : >> { %2511 = vmatpush3.bf16.msra.mxu1 %v2510_v29  ;;  %2578 = vmatprep.subr.bf16.mxu0 %v3023_v14  ;;  %v1373_v29 = vld [vmem:[#allocation8 + $0x100] sm:$0xff] }
 0x474   : >> { %2512 = vmatprep.subr.bf16.mxu1 %v3023_v14  ;;  %v2543_v31 = vpack.c.bf16 %v1374_v30, %v1373_v29 }
 0x476   : >> { %2580 = vmatpush3.bf16.msra.mxu0 %v3475_v57 }
 0x477   : >> { %2514 = vmatpush3.bf16.msra.mxu1 %v2513_v32  ;;  %2581 = vmatprep.subr.bf16.mxu0 %v3023_v14  ;;  %v1375_v32 = vld [vmem:[#allocation8 + $0x110] sm:$0xff] }
 0x478   : >> { %2515 = vmatprep.subr.bf16.mxu1 %v3023_v14  ;;  %v2546_v35 = vpack.c.bf16 %v1376_v33, %v1375_v32 }
 0x47a   : >> { %2583 = vmatpush3.bf16.msra.mxu0 %v3479_v60 }
 0x47b   : >> { %2517 = vmatpush3.bf16.msra.mxu1 %v2516_v37  ;;  %2584 = vmatprep.subr.bf16.mxu0 %v3023_v14  ;;  %v1377_v37 = vld [vmem:[#allocation8 + $0x120] sm:$0xff] }
 0x47c   : >> { %2518 = vmatprep.subr.bf16.mxu1 %v3023_v14  ;;  %v2549_v40 = vpack.c.bf16 %v1378_v38, %v1377_v37 }
 0x47e   : >> { %2586 = vmatpush3.bf16.msra.mxu0 %v3483_v36 }
 0x47f   : >> { %2587 = vmatprep.subr.bf16.mxu0 %v3023_v14 }
 0x530   : >> { %v1047_v62 = vpop.f32.mrb[0].mxu0 }
 0x531   : >> { %v2188_v63 = vpop.f32.mrb[1].mxu0  ;;  %2222 = vmatmul.mubr.f32.vlgmr.msra.gmra.mrb[0].mxu1 %v1047_v62  ;;  %v2588_v62 = vpack.c.bf16 %v1475_v48, %v1474_v61 }
 0x532   : >> { %2520 = vmatpush3.bf16.msra.mxu1 %v2519_v45  ;;  %2261 = vmatprep.mubr.msk.f32.mxu1 %vm3022_vm3, %v3021_v12  ;;  %v2564_v45 = vpack.c.bf16 %v1388_v42, %v1387_v39 }
 0x533   : >> { %2521 = vmatprep.subr.bf16.mxu1 %v3023_v14  ;;  %2589 = vmatpush3.bf16.msra.mxu0 %v2588_v62 }
 0x534   : >> { %v1207_v5 = vpop.f32.mrb[2].mxu0  ;;  %2590 = vmatprep.subr.bf16.mxu0 %v3023_v14 }
 0x535   : >> { %v2228_v6 = vpop.f32.mrb[3].mxu0 }
 0x536   : >> { %2523 = vmatpush3.bf16.msra.mxu1 %v2522_v4 }
 0x537   : >> { %2524 = vmatprep.subr.bf16.mxu1 %v3023_v14 }
 0x538   : >> { %v3492_v13 = vpop.f32.mrb[4].mxu0 }
 0x539   : >> { %v2268_v15 = vpop.f32.mrb[5].mxu0 }
 0x53a   : >> { %2526 = vmatpush3.bf16.msra.mxu1 %v2525_v8 }
 0x53b   : >> { %2527 = vmatprep.subr.bf16.mxu1 %v3023_v14 }
 0x53e   : >> { %2529 = vmatpush3.bf16.msra.mxu1 %v2528_v16 }
 0x53f   : >> { %2530 = vmatprep.subr.bf16.mxu1 %v3023_v14 }
 0x542   : >> { %2532 = vmatpush3.bf16.msra.mxu1 %v2531_v19 }
 0x543   : >> { %2533 = vmatprep.subr.bf16.mxu1 %v3023_v14 }
 0x546   : >> { %2535 = vmatpush3.bf16.msra.mxu1 %v2534_v22 }
 0x547   : >> { %2536 = vmatprep.subr.bf16.mxu1 %v3023_v14 }
 0x54a   : >> { %2538 = vmatpush3.bf16.msra.mxu1 %v2537_v25 }
 0x54b   : >> { %2539 = vmatprep.subr.bf16.mxu1 %v3023_v14 }
 0x54e   : >> { %2541 = vmatpush3.bf16.msra.mxu1 %v2540_v28 }
 0x54f   : >> { %2542 = vmatprep.subr.bf16.mxu1 %v3023_v14 }
 0x551   : >> { %2262 = vmatmul.mubr.f32.vlgmr.msra.gmra.mrb[0].mxu1 %v1207_v5 }
 0x552   : >> { %2544 = vmatpush3.bf16.msra.mxu1 %v2543_v31  ;;  %2301 = vmatprep.mubr.msk.f32.mxu1 %vm3022_vm3, %v3021_v12 }
 0x553   : >> { %2545 = vmatprep.subr.bf16.mxu1 %v3023_v14 }
 0x556   : >> { %2547 = vmatpush3.bf16.msra.mxu1 %v2546_v35 }
 0x557   : >> { %2548 = vmatprep.subr.bf16.mxu1 %v3023_v14 }
 0x55a   : >> { %2550 = vmatpush3.bf16.msra.mxu1 %v2549_v40 }
 0x55b   : >> { %2551 = vmatprep.subr.bf16.mxu1 %v3023_v14 }
 0x55e   : >> { %2553 = vmatpush3.bf16.msra.mxu1 %v2552_v47 }
 0x55f   : >> { %2554 = vmatprep.subr.bf16.mxu1 %v3023_v14 }
 0x562   : >> { %2556 = vmatpush3.bf16.msra.mxu1 %v2555_v53 }
 0x563   : >> { %2557 = vmatprep.subr.bf16.mxu1 %v3023_v14 }
 0x566   : >> { %2559 = vmatpush3.bf16.msra.mxu1 %v2558_v58 }
 0x567   : >> { %2560 = vmatprep.subr.bf16.mxu1 %v3023_v14 }
 0x56a   : >> { %2562 = vmatpush3.bf16.msra.mxu1 %v2561_v34 }
 0x56b   : >> { %2563 = vmatprep.subr.bf16.mxu1 %v3023_v14 }
 0x56e   : >> { %2565 = vmatpush3.bf16.msra.mxu1 %v2564_v45 }
 0x571   : >> { %2302 = vmatmul.mubr.f32.vlgmr.msra.gmra.mrb[0].mxu1 %v3492_v13 }
 0x644   : >> { %v1455_v63 = vpop.f32.mrb[0].mxu1 }
 0x645   : >> { %v2619_v4 = vadd.f32 %v1455_v63, %v3304_v3  ;;  %v2303_v9 = vpop.f32.mrb[1].mxu1 }
 0x647   : >> { %2337 = vmatmul.mubr.f32.vlgmr.msra.gmra.mrb[6].mxu0 %v2619_v4 }
 0x648   : >> { %2592 = vmatpush3.bf16.msra.mxu0 %v3460_v43  ;;  %2371 = vmatprep.mubr.msk.f32.mxu0 %vm3022_vm3, %v3021_v12 }
 0x649   : >> { %2593 = vmatprep.subr.bf16.mxu0 %v3023_v14 }
 0x64c   : >> { %2595 = vmatpush3.bf16.msra.mxu0 %v3463_v46 }
 0x64d   : >> { %2596 = vmatprep.subr.bf16.mxu0 %v3023_v14 }
 0x650   : >> { %2598 = vmatpush3.bf16.msra.mxu0 %v3467_v50 }
 0x651   : >> { %2599 = vmatprep.subr.bf16.mxu0 %v3023_v14 }
 0x654   : >> { %2601 = vmatpush3.bf16.msra.mxu0 %v3471_v54 }
 0x655   : >> { %2602 = vmatprep.subr.bf16.mxu0 %v3023_v14 }
 0x658   : >> { %2604 = vmatpush3.bf16.msra.mxu0 %v3475_v57 }
 0x659   : >> { %2605 = vmatprep.subr.bf16.mxu0 %v3023_v14 }
 0x65c   : >> { %2607 = vmatpush3.bf16.msra.mxu0 %v3479_v60 }
 0x65d   : >> { %2608 = vmatprep.subr.bf16.mxu0 %v3023_v14 }
 0x660   : >> { %2610 = vmatpush3.bf16.msra.mxu0 %v3483_v36 }
 0x661   : >> { %2611 = vmatprep.subr.bf16.mxu0 %v3023_v14 }
 0x664   : >> { %2613 = vmatpush3.bf16.msra.mxu0 %v2588_v62 }
 0x71a   : >> { %v1542_v12 = vpop.f32.mrb[6].mxu0 }
 0x71b   : >> { %v1546_v43 = vsub.f32 %v2619_v4, %v1542_v12  ;;  %v2338_v46 = vpop.f32.mrb[7].mxu0 }
 0x71d   : >> { %v1547_v50 = vmul.f32 %v1546_v43, %v1546_v43 }
 0x71f   : >> { %2372 = vmatmul.mubr.f32.vlgmr.msra.gmra.mrb[8].mxu0 %v1547_v50 }
 0x7f2   : >> { %v1614_v54 = vpop.f32.mrb[8].mxu0 }
 0x7f3   : >> { %v1615_v57 = vadd.f32 1e-05, %v1614_v54  ;;  %v2373_v51 = vpop.f32.mrb[9].mxu0 }
 0x7f5   : >> { %2757 = vrsqrt.f32 %v1615_v57 }
 0x7ff   : >> { %v2758_v5 = vpop.eup %2757 }
 0x800   : >> { %v1619_v60 = vmul.f32 %v2758_v5, %v1546_v43 }
 0x802   : >> { %v1621_v6 = vmin.f32 %v1619_v60, 0.0  ;;  %vm1620_vm4 = vcmp.gt.f32.partialorder %v1619_v60, 0.0 }
 0x804   : >> { %v1622_v8 = vmul.f32 1.442695, %v1621_v6 }
 0x806   : >> { %2759 = vpow2.f32 %v1622_v8 }
 0x810   : >> { %v2760_v14 = vpop.eup %2759  ;;  %973 = sbr.rel (!%p971_p5) target bundleno = 1114 (0x45a), region = 135 }
 0x811   : >> { %v1803_v36 = vadd.f32 -1.0, %v2760_v14 }
 0x813   : >> { %v1625_v11 = vsel %vm1620_vm4, %v1619_v60, %v1803_v36 }
 0x814   : >> { %v1629_v8 = vadd.f32 %v1628_v10, %v1625_v11  }
 0x816   : >> { %1630 = vst [vmem:[%s1627_s9] sm:$0xff] %v1629_v8 }
 0x817   : > { %2916 = shalt.err (!%p2913_p0)
}
 0x818   : > { %s2917_s24 = scalar_lea.hbm %s3539_s30, 2048  ;;  %s2921_s16 = scalar_lea.hbm %s3591_s5, 4096 }
 0x819   : > { %p2918_p11 = scmp.ne.s32.totalorder %s3539_s30, %s2917_s24  ;;  %p2922_p8 = scmp.lt.u32.totalorder %s3539_s30, %s3591_s5 }
 0x81a   : > { %p2923_p3 = scmp.lt.u32.totalorder %s2921_s16, %s2917_s24  ;;  %p2925_p7 = scmp.lt.u32.totalorder %s2917_s24, %s3539_s30 }
 0x81b   : > { %p2919_p6 = pnand %p2918_p11, %p3225_p10 }
 0x81c   : > { %p2924_p5 = por %p2923_p3, %p2922_p8 }
 0x81d   : > { %p2920_p4 = pneg %p2919_p6 }
 0x81e   : > { %p2926_p12 = por %p2925_p7, %p2924_p5 }
 0x820   : > { %p2927_p1 = pnand %p2926_p12, %p2920_p4 }
 0x822   : > { %2930 = shalt.err (!%p2927_p1)
}
 0x823   : > { %s3025_s15 = smov 128   ;;  %s3026_s28 = smov 8  }
 0x824   : > { %2642 = dma.vmem_to_hbm [thread:$0]  (%p3225_p10), %s3542_s11, 2048, %s3539_s30, %s1632_s12, %s3025_s15, %s3025_s15, %s3026_s28  }
 0x825 PF: > { %s1660_s10 = sand.u32 1, %s2981_s18   ;;  %p3610_p2 = scmp.ne.s32.totalorder %s3596_s25, 0 }
 0x826   : > { %p3611_p13 = scmp.ge.s32.totalorder %s2993_s21, 2  ;;  %s1661_s26 = scalar_lea.sflag [#allocation4], %s1660_s10 }
 0x828   : > { %p2662_p9 = pnand %p3611_p13, %p3610_p2 }
 0x82a   : > { %2976 = dma.done.wait (!%p2662_p9), %s1661_s26, 2048  }
 0x82b   : > { %2978 = vsyncadd (!%p2662_p9), %s1661_s26, 4294965248  ;;  %p20_p0 = scmp.ge.s32.totalorder %s3215_s14, 4   ;;  %s3612_s18 = smov %s2985_s19 }
 0x82c   : > { %s3613_s19 = smov %s2989_s20  ;;  %s3614_s20 = smov %s3231_s7 }
 0x82d   : > { %s3615_s21 = smov %s3215_s14  ;;  %22 = sbr.rel (!%p20_p0) target bundleno = 7 (0x7), region = 146 }
 0x834   :  { %1666 = vsyncpa [#allocation3], 1 }
 0x835   :  { %1668 = vsyncpa [#allocation3 + $0x1], 1 }
 0x836   :  { %1669 = vsyncpa [#allocation6], 1 }
 0x837   :  { %1670 = vsyncpa [#allocation9], 1 }
 0x838   :  { %1671 = vsyncpa [#allocation4], 1 }
 0x839   :  { %1673 = vsyncpa [#allocation4 + $0x1], 1 }

</bundles_post_ra>
